<compile_context>
chip_gen: v7x
topology: tpu7x:2x2x1
jax: 0.10.0
libtpu: 0.0.40
codegen_flags: <defaults>
</compile_context>

<pallas_src>
import math
import functools

import jax
import jax.numpy as jnp
from jax import lax
from jax.experimental import pallas as pl
from jax.experimental.pallas import tpu as pltpu


# ---------------------------------------------------------------------------
# In-kernel math helpers (f32)
# ---------------------------------------------------------------------------
def _erf(x):
    # Abramowitz & Stegun 7.1.26 rational approximation of erf, |err| <= 1.5e-7
    # (float32-accurate).  The 1/(1 + p|x|) divide is routed to the EUP via
    # pl.reciprocal(approx=True); the polynomial stays on the VALU.
    p = 0.3275911
    a1, a2, a3, a4, a5 = (0.254829592, -0.284496736, 1.421413741,
                          -1.453152027, 1.061405429)
    sgn = jnp.where(x >= 0.0, 1.0, -1.0)
    ax = jnp.abs(x)
    t = pl.reciprocal(1.0 + p * ax, approx=True)
    poly = ((((a5 * t + a4) * t + a3) * t + a2) * t + a1) * t
    return sgn * (1.0 - poly * jnp.exp(-ax * ax))


def _gelu(x):
    # Exact (erf-based) GELU, matching torch.nn.GELU() default.
    return 0.5 * x * (1.0 + _erf(x * (1.0 / math.sqrt(2.0))))


def _layernorm(x, g, b, eps=1e-5):
    # PyTorch nn.LayerNorm: biased variance over last dim, default eps=1e-5.
    mu = jnp.mean(x, axis=-1, keepdims=True)
    var = jnp.mean((x - mu) * (x - mu), axis=-1, keepdims=True)
    return (x - mu) * lax.rsqrt(var + eps) * g + b


# ---------------------------------------------------------------------------
# Fused TransformerEncoder kernel (block_b batch elements per grid step)
# ---------------------------------------------------------------------------
def _encoder_kernel(x_ref,
                    ln1g_ref, ln1b_ref,
                    wq_ref, bq_ref, wk_ref, bk_ref, wv_ref, bv_ref,
                    wo_ref, bo_ref,
                    ln2g_ref, ln2b_ref,
                    w1_ref, b1_ref, w2_ref, b2_ref,
                    out_ref,
                    *, head, skip_scalar, matmul_dtype):
    bblk, n, f = x_ref.shape
    hd = f // head
    bn = bblk * n
    inv_sqrt_d = 1.0 / (f ** 0.5)        # module scales by sqrt(feats), not sqrt(head_dim)

    # Fold batch into the matmul M dimension.
    x = x_ref[...].astype(jnp.float32).reshape(bn, f)          # (bn, F)

    # ---- LayerNorm 1 ----
    h1 = _layernorm(x, ln1g_ref[...], ln1b_ref[...])

    # ---- QKV projections (bf16 operands, f32 accumulation) ----
    h1m = h1.astype(matmul_dtype)
    q = jnp.dot(h1m, wq_ref[...], preferred_element_type=jnp.float32) + bq_ref[...]
    k = jnp.dot(h1m, wk_ref[...], preferred_element_type=jnp.float32) + bk_ref[...]
    v = jnp.dot(h1m, wv_ref[...], preferred_element_type=jnp.float32) + bv_ref[...]

    # ---- Batched multi-head self-attention ----
    # (bn, F) -> (bblk, n, head, hd) -> (bblk, head, n, hd) -> (g=bblk*head, n, hd)
    # Cast to bf16 *before* the transpose: the head-split relayout is the XLU /
    # VMEM hot spot for small head_dim, and bf16 halves its traffic.
    # TODO(synk): replace with a transpose-free 4-D dot_general (batch dims
    # ((0,2),(0,2))) once that lowering path is validated on target Mosaic.
    def to_heads(t):
        t = t.astype(matmul_dtype).reshape(bblk, n, head, hd)
        t = jnp.transpose(t, (0, 2, 1, 3))
        return t.reshape(bblk * head, n, hd)

    qh = to_heads(q)
    kh = to_heads(k)
    vh = to_heads(v)

    # scores[g, i, j] = sum_d q[g, i, d] * k[g, j, d]   (scaled by 1/sqrt(feats))
    # NOTE: at hd = F/head these matmuls are structurally MXU-underfilled; the
    # FLOPs live in the QKV / O / MLP projections, so no tile tuning here.
    # TODO(synk): flash-style KV tiling for large n (see header).
    s = lax.dot_general(qh, kh, (((2,), (2,)), ((0,), (0,))),
                        preferred_element_type=jnp.float32) * inv_sqrt_d   # (g, n, n)
    s = s - jnp.max(s, axis=-1, keepdims=True)
    p = jnp.exp(s)
    denom = jnp.sum(p, axis=-1, keepdims=True)                             # (g, n, 1)
    # Deferred softmax normalization: (p @ v) * 1/rowsum, reciprocal on the EUP.
    o = lax.dot_general(p.astype(matmul_dtype), vh, (((2,), (1,)), ((0,), (0,))),
                        preferred_element_type=jnp.float32)                # (g, n, hd)
    o = o * pl.reciprocal(denom, approx=True)

    # einsum('bhij,bhjf->bihf').flatten(2): head-major concat along features.
    # bf16 before the single output transpose as well.
    attn = jnp.transpose(o.astype(matmul_dtype).reshape(bblk, head, n, hd),
                         (0, 2, 1, 3)).reshape(bn, f)

    o_proj = jnp.dot(attn, wo_ref[...],
                     preferred_element_type=jnp.float32) + bo_ref[...]
    # nn.Dropout(p=0.1): identity in eval/inference mode
    out1 = o_proj + skip_scalar * x

    # ---- LayerNorm 2 + MLP (GELU after BOTH linears, as in the module) ----
    # TODO(synk): tile w1/w2 over mlp_hidden on v7x for production sizes (see header).
    h2 = _layernorm(out1, ln2g_ref[...], ln2b_ref[...])
    m = jnp.dot(h2.astype(matmul_dtype), w1_ref[...],
                preferred_element_type=jnp.float32) + b1_ref[...]
    m = _gelu(m)
    m = jnp.dot(m.astype(matmul_dtype), w2_ref[...],
                preferred_element_type=jnp.float32) + b2_ref[...]
    m = _gelu(m)

    y = m + skip_scalar * out1
    out_ref[...] = y.reshape(bblk, n, f).astype(out_ref.dtype)


# ---------------------------------------------------------------------------
# Wrapper
# ---------------------------------------------------------------------------
def _pick_block_b(b, n, target_m=512):
    """Largest divisor of b with block_b*N <= max(target_m, N), capped at b//2
    (when b >= 2) so the 'parallel' batch grid axis has >= 2 steps and can
    shard across both v7x TensorCores."""
    cap = b // 2 if b >= 2 else 1
    limit = max(target_m, n)
    best = 1
    for cand in range(1, cap + 1):
        if b % cand == 0 and cand * n <= limit:
            best = cand
    return best


def _vmem_capacity_bytes():
    try:
        return int(pltpu.get_tpu_info().vmem_capacity_bytes)
    except Exception:
        return 64 * 1024 * 1024    # conservative (v7x-sized) fallback


def _param_spec(shape):
    """Full-array param block, constant index map, single-buffered if supported."""
    idx = lambda i: (0, 0)
    try:
        return pl.BlockSpec(shape, idx, pipeline_mode=pl.Buffered(1))
    except Exception:
        # Older jax without pipeline_mode / Buffered: fall back to default
        # (double-buffered) resident block.
        return pl.BlockSpec(shape, idx)


def transformer_encoder(x, params, *, head=8, skip_scalar=1.0,
                        block_b=None, matmul_dtype=jnp.bfloat16):
    b, n, f = x.shape
    assert f % head == 0
    if block_b is None:
        block_b = _pick_block_b(b, n)
    assert b % block_b == 0

    def w(name):   # weight matrices: cast once here -> halves VMEM residency & DMA
        return params[name].astype(matmul_dtype)

    param_list = [
        params["ln1_g"], params["ln1_b"],
        w("wq"), params["bq"], w("wk"), params["bk"],
        w("wv"), params["bv"], w("wo"), params["bo"],
        params["ln2_g"], params["ln2_b"],
        w("w1"), params["b1"], w("w2"), params["b2"],
    ]

    in_specs = [pl.BlockSpec((block_b, n, f), lambda i: (i, 0, 0))]
    # All params are 2D, resident across grid steps, single-buffered.
    in_specs += [_param_spec(p.shape) for p in param_list]

    # VMEM budget: resident params (1x, single-buffered) + double-buffered
    # activation blocks + f32 temporaries (LN/QKV/attn/MLP/scores), with a
    # generation-aware cap (~15% headroom under physical VMEM).
    mlp_hidden = params["w1"].shape[1]
    param_bytes = sum(int(p.size) * p.dtype.itemsize for p in param_list)
    act_bytes = 2 * 2 * block_b * n * f * x.dtype.itemsize            # in+out, double-buffered
    tmp_bytes = 4 * block_b * n * (8 * f + 2 * mlp_hidden + head * n)  # f32 temps
    cap = int(0.85 * _vmem_capacity_bytes())
    vmem_limit = int(max(32 * 1024 * 1024,
                         min(cap, 2 * (param_bytes + act_bytes + tmp_bytes))))

    kernel = functools.partial(_encoder_kernel, head=head,
                               skip_scalar=skip_scalar, matmul_dtype=matmul_dtype)

    return pl.pallas_call(
        kernel,
        grid=(b // block_b,),
        in_specs=in_specs,
        out_specs=pl.BlockSpec((block_b, n, f), lambda i: (i, 0, 0)),
        out_shape=jax.ShapeDtypeStruct((b, n, f), x.dtype),
        compiler_params=pltpu.CompilerParams(
            dimension_semantics=("parallel",),
            vmem_limit_bytes=vmem_limit),
    )(x, *param_list)


# ---------------------------------------------------------------------------
# Deterministic parameter init (shapes from the module's __init__)
# ---------------------------------------------------------------------------
def init_params(key, feats, mlp_hidden):
    def linear(k, fin, fout):
        bound = 1.0 / math.sqrt(fin)
        kw, kb = jax.random.split(k)
        wt = jax.random.uniform(kw, (fin, fout), jnp.float32, -bound, bound)
        bs = jax.random.uniform(kb, (1, fout), jnp.float32, -bound, bound)
        return wt, bs

    ks = jax.random.split(key, 6)
    wq, bq = linear(ks[0], feats, feats)
    wk, bk = linear(ks[1], feats, feats)
    wv, bv = linear(ks[2], feats, feats)
    wo, bo = linear(ks[3], feats, feats)
    w1, b1 = linear(ks[4], feats, mlp_hidden)
    w2, b2 = linear(ks[5], mlp_hidden, feats)

    return dict(
        ln1_g=jnp.ones((1, feats), jnp.float32),
        ln1_b=jnp.zeros((1, feats), jnp.float32),
        wq=wq, bq=bq, wk=wk, bk=bk, wv=wv, bv=bv, wo=wo, bo=bo,
        ln2_g=jnp.ones((1, feats), jnp.float32),
        ln2_b=jnp.zeros((1, feats), jnp.float32),
        w1=w1, b1=b1, w2=w2, b2=b2,
    )


if __name__ == "__main__":
    # Lane-dense example sizing: F = 128 (multiple of the 128-lane vreg width).
    # With B=2 the batch cap makes block_b=1 -> grid=2 (both v7x TCs busy).
    B, N, FEATS, HEAD, MLP_HIDDEN = 2, 8, 128, 8, 256
    SKIP_SCALAR = 1.0

    key = jax.random.PRNGKey(0)
    kx, kp = jax.random.split(key)
    x = jax.random.normal(kx, (B, N, FEATS), dtype=jnp.float32)
    params = init_params(kp, FEATS, MLP_HIDDEN)

    out = transformer_encoder(x, params, head=HEAD, skip_scalar=SKIP_SCALAR)
    out = jax.block_until_ready(out)
    assert out.shape == (B, N, FEATS) and out.dtype == jnp.float32
    assert bool(jnp.all(jnp.isfinite(out)))

    print("KERNEL_OK")
</pallas_src>

<mosaic_0001>
module attributes {stable_mosaic.version = 11 : i64} {
  func.func @_encoder_kernel(%arg0: i32, %arg1: memref<1x8x128xf32, #tpu.memory_space<vmem>>, %arg2: memref<1x128xf32, #tpu.memory_space<vmem>>, %arg3: memref<1x128xf32, #tpu.memory_space<vmem>>, %arg4: memref<128x128xbf16, #tpu.memory_space<vmem>>, %arg5: memref<1x128xf32, #tpu.memory_space<vmem>>, %arg6: memref<128x128xbf16, #tpu.memory_space<vmem>>, %arg7: memref<1x128xf32, #tpu.memory_space<vmem>>, %arg8: memref<128x128xbf16, #tpu.memory_space<vmem>>, %arg9: memref<1x128xf32, #tpu.memory_space<vmem>>, %arg10: memref<128x128xbf16, #tpu.memory_space<vmem>>, %arg11: memref<1x128xf32, #tpu.memory_space<vmem>>, %arg12: memref<1x128xf32, #tpu.memory_space<vmem>>, %arg13: memref<1x128xf32, #tpu.memory_space<vmem>>, %arg14: memref<128x256xbf16, #tpu.memory_space<vmem>>, %arg15: memref<1x256xf32, #tpu.memory_space<vmem>>, %arg16: memref<256x128xbf16, #tpu.memory_space<vmem>>, %arg17: memref<1x128xf32, #tpu.memory_space<vmem>>, %arg18: memref<1x8x128xf32, #tpu.memory_space<vmem>>) attributes {dimension_semantics = [#tpu.dimension_semantics<parallel>], iteration_bounds = array<i64: 2>, scalar_prefetch = 0 : i64, scratch_operands = 0 : i64, tpu.core_type = #tpu.core_type<tc>, window_params = [{transform_indices = @transform_0, window_bounds = array<i64: 1, 8, 128>}, {pipeline_mode = #tpu.pipeline_mode<synchronous>, transform_indices = @transform_1, window_bounds = array<i64: 1, 128>}, {pipeline_mode = #tpu.pipeline_mode<synchronous>, transform_indices = @transform_2, window_bounds = array<i64: 1, 128>}, {pipeline_mode = #tpu.pipeline_mode<synchronous>, transform_indices = @transform_3, window_bounds = array<i64: 128, 128>}, {pipeline_mode = #tpu.pipeline_mode<synchronous>, transform_indices = @transform_4, window_bounds = array<i64: 1, 128>}, {pipeline_mode = #tpu.pipeline_mode<synchronous>, transform_indices = @transform_5, window_bounds = array<i64: 128, 128>}, {pipeline_mode = #tpu.pipeline_mode<synchronous>, transform_indices = @transform_6, window_bounds = array<i64: 1, 128>}, {pipeline_mode = #tpu.pipeline_mode<synchronous>, transform_indices = @transform_7, window_bounds = array<i64: 128, 128>}, {pipeline_mode = #tpu.pipeline_mode<synchronous>, transform_indices = @transform_8, window_bounds = array<i64: 1, 128>}, {pipeline_mode = #tpu.pipeline_mode<synchronous>, transform_indices = @transform_9, window_bounds = array<i64: 128, 128>}, {pipeline_mode = #tpu.pipeline_mode<synchronous>, transform_indices = @transform_10, window_bounds = array<i64: 1, 128>}, {pipeline_mode = #tpu.pipeline_mode<synchronous>, transform_indices = @transform_11, window_bounds = array<i64: 1, 128>}, {pipeline_mode = #tpu.pipeline_mode<synchronous>, transform_indices = @transform_12, window_bounds = array<i64: 1, 128>}, {pipeline_mode = #tpu.pipeline_mode<synchronous>, transform_indices = @transform_13, window_bounds = array<i64: 128, 256>}, {pipeline_mode = #tpu.pipeline_mode<synchronous>, transform_indices = @transform_14, window_bounds = array<i64: 1, 256>}, {pipeline_mode = #tpu.pipeline_mode<synchronous>, transform_indices = @transform_15, window_bounds = array<i64: 256, 128>}, {pipeline_mode = #tpu.pipeline_mode<synchronous>, transform_indices = @transform_16, window_bounds = array<i64: 1, 128>}, {transform_indices = @transform_17, window_bounds = array<i64: 1, 8, 128>}]} {
    %c0 = arith.constant 0 : index
    %c0_0 = arith.constant 0 : index
    %c0_1 = arith.constant 0 : index
    %0 = vector.load %arg1[%c0, %c0_0, %c0_1] : memref<1x8x128xf32, #tpu.memory_space<vmem>>, vector<1x8x128xf32>
    %1 = vector.shape_cast %0 : vector<1x8x128xf32> to vector<8x128xf32>
    %c0_2 = arith.constant 0 : index
    %c0_3 = arith.constant 0 : index
    %2 = vector.load %arg2[%c0_2, %c0_3] : memref<1x128xf32, #tpu.memory_space<vmem>>, vector<1x128xf32>
    %c0_4 = arith.constant 0 : index
    %c0_5 = arith.constant 0 : index
    %3 = vector.load %arg3[%c0_4, %c0_5] : memref<1x128xf32, #tpu.memory_space<vmem>>, vector<1x128xf32>
    %cst = arith.constant dense<0.000000e+00> : vector<8xf32>
    %4 = vector.multi_reduction <add>, %1, %cst [1] : vector<8x128xf32> to vector<8xf32>
    %5 = vector.shape_cast %4 : vector<8xf32> to vector<8x1xf32>
    %cst_6 = arith.constant 1.280000e+02 : f32
    %6 = vector.broadcast %cst_6 : f32 to vector<8x1xf32>
    %7 = arith.divf %5, %6 : vector<8x1xf32>
    %8 = vector.broadcast %7 : vector<8x1xf32> to vector<8x128xf32>
    %9 = arith.subf %1, %8 : vector<8x128xf32>
    %10 = vector.broadcast %7 : vector<8x1xf32> to vector<8x128xf32>
    %11 = arith.subf %1, %10 : vector<8x128xf32>
    %12 = arith.mulf %9, %11 : vector<8x128xf32>
    %cst_7 = arith.constant dense<0.000000e+00> : vector<8xf32>
    %13 = vector.multi_reduction <add>, %12, %cst_7 [1] : vector<8x128xf32> to vector<8xf32>
    %14 = vector.shape_cast %13 : vector<8xf32> to vector<8x1xf32>
    %cst_8 = arith.constant 1.280000e+02 : f32
    %15 = vector.broadcast %cst_8 : f32 to vector<8x1xf32>
    %16 = arith.divf %14, %15 : vector<8x1xf32>
    %17 = vector.broadcast %7 : vector<8x1xf32> to vector<8x128xf32>
    %18 = arith.subf %1, %17 : vector<8x128xf32>
    %cst_9 = arith.constant 9.99999974E-6 : f32
    %19 = vector.broadcast %cst_9 : f32 to vector<8x1xf32>
    %20 = arith.addf %16, %19 : vector<8x1xf32>
    %21 = math.rsqrt %20 : vector<8x1xf32>
    %22 = vector.broadcast %21 : vector<8x1xf32> to vector<8x128xf32>
    %23 = arith.mulf %18, %22 : vector<8x128xf32>
    %24 = vector.broadcast %2 : vector<1x128xf32> to vector<8x128xf32>
    %25 = arith.mulf %23, %24 : vector<8x128xf32>
    %26 = vector.broadcast %3 : vector<1x128xf32> to vector<8x128xf32>
    %27 = arith.addf %25, %26 : vector<8x128xf32>
    %28 = arith.truncf %27 : vector<8x128xf32> to vector<8x128xbf16>
    %c0_10 = arith.constant 0 : index
    %c0_11 = arith.constant 0 : index
    %29 = vector.load %arg4[%c0_10, %c0_11] : memref<128x128xbf16, #tpu.memory_space<vmem>>, vector<128x128xbf16>
    %cst_12 = arith.constant dense<0.000000e+00> : vector<8x128xf32>
    %30 = tpu.matmul %28, %29, %cst_12 {dimension_numbers = #tpu.dot_dimension_numbers<[1], [0], [0], [1], [0, 0, 1, 1], [], []>} : vector<8x128xbf16>, vector<128x128xbf16>, vector<8x128xf32> -> vector<8x128xf32>
    %c0_13 = arith.constant 0 : index
    %c0_14 = arith.constant 0 : index
    %31 = vector.load %arg5[%c0_13, %c0_14] : memref<1x128xf32, #tpu.memory_space<vmem>>, vector<1x128xf32>
    %32 = vector.broadcast %31 : vector<1x128xf32> to vector<8x128xf32>
    %33 = arith.addf %30, %32 : vector<8x128xf32>
    %c0_15 = arith.constant 0 : index
    %c0_16 = arith.constant 0 : index
    %34 = vector.load %arg6[%c0_15, %c0_16] : memref<128x128xbf16, #tpu.memory_space<vmem>>, vector<128x128xbf16>
    %cst_17 = arith.constant dense<0.000000e+00> : vector<8x128xf32>
    %35 = tpu.matmul %28, %34, %cst_17 {dimension_numbers = #tpu.dot_dimension_numbers<[1], [0], [0], [1], [0, 0, 1, 1], [], []>} : vector<8x128xbf16>, vector<128x128xbf16>, vector<8x128xf32> -> vector<8x128xf32>
    %c0_18 = arith.constant 0 : index
    %c0_19 = arith.constant 0 : index
    %36 = vector.load %arg7[%c0_18, %c0_19] : memref<1x128xf32, #tpu.memory_space<vmem>>, vector<1x128xf32>
    %37 = vector.broadcast %36 : vector<1x128xf32> to vector<8x128xf32>
    %38 = arith.addf %35, %37 : vector<8x128xf32>
    %c0_20 = arith.constant 0 : index
    %c0_21 = arith.constant 0 : index
    %39 = vector.load %arg8[%c0_20, %c0_21] : memref<128x128xbf16, #tpu.memory_space<vmem>>, vector<128x128xbf16>
    %cst_22 = arith.constant dense<0.000000e+00> : vector<8x128xf32>
    %40 = tpu.matmul %28, %39, %cst_22 {dimension_numbers = #tpu.dot_dimension_numbers<[1], [0], [0], [1], [0, 0, 1, 1], [], []>} : vector<8x128xbf16>, vector<128x128xbf16>, vector<8x128xf32> -> vector<8x128xf32>
    %c0_23 = arith.constant 0 : index
    %c0_24 = arith.constant 0 : index
    %41 = vector.load %arg9[%c0_23, %c0_24] : memref<1x128xf32, #tpu.memory_space<vmem>>, vector<1x128xf32>
    %42 = vector.broadcast %41 : vector<1x128xf32> to vector<8x128xf32>
    %43 = arith.addf %40, %42 : vector<8x128xf32>
    %44 = arith.truncf %33 : vector<8x128xf32> to vector<8x128xbf16>
    %45 = vector.shape_cast %44 : vector<8x128xbf16> to vector<1x8x8x16xbf16>
    %46 = tpu.transpose %45, [0, 2, 1, 3] : vector<1x8x8x16xbf16> -> vector<1x8x8x16xbf16>
    %47 = vector.shape_cast %46 : vector<1x8x8x16xbf16> to vector<8x8x16xbf16>
    %48 = arith.truncf %38 : vector<8x128xf32> to vector<8x128xbf16>
    %49 = vector.shape_cast %48 : vector<8x128xbf16> to vector<1x8x8x16xbf16>
    %50 = tpu.transpose %49, [0, 2, 1, 3] : vector<1x8x8x16xbf16> -> vector<1x8x8x16xbf16>
    %51 = vector.shape_cast %50 : vector<1x8x8x16xbf16> to vector<8x8x16xbf16>
    %52 = arith.truncf %43 : vector<8x128xf32> to vector<8x128xbf16>
    %53 = vector.shape_cast %52 : vector<8x128xbf16> to vector<1x8x8x16xbf16>
    %54 = tpu.transpose %53, [0, 2, 1, 3] : vector<1x8x8x16xbf16> -> vector<1x8x8x16xbf16>
    %55 = vector.shape_cast %54 : vector<1x8x8x16xbf16> to vector<8x8x16xbf16>
    %cst_25 = arith.constant dense<0.000000e+00> : vector<8x8x8xf32>
    %56 = tpu.matmul %47, %51, %cst_25 {dimension_numbers = #tpu.dot_dimension_numbers<[2], [2], [1], [1], [0, 0, 0, 1, 1, 1], [0], [0]>} : vector<8x8x16xbf16>, vector<8x8x16xbf16>, vector<8x8x8xf32> -> vector<8x8x8xf32>
    %cst_26 = arith.constant 0.0883883461 : f32
    %57 = vector.broadcast %cst_26 : f32 to vector<8x8x8xf32>
    %58 = arith.mulf %56, %57 : vector<8x8x8xf32>
    %cst_27 = arith.constant dense<0xFF800000> : vector<8x8xf32>
    %59 = vector.multi_reduction <maximumf>, %58, %cst_27 [2] : vector<8x8x8xf32> to vector<8x8xf32>
    %60 = vector.shape_cast %59 : vector<8x8xf32> to vector<8x8x1xf32>
    %61 = vector.broadcast %60 : vector<8x8x1xf32> to vector<8x8x8xf32>
    %62 = arith.subf %58, %61 : vector<8x8x8xf32>
    %63 = math.exp %62 : vector<8x8x8xf32>
    %cst_28 = arith.constant dense<0.000000e+00> : vector<8x8xf32>
    %64 = vector.multi_reduction <add>, %63, %cst_28 [2] : vector<8x8x8xf32> to vector<8x8xf32>
    %65 = vector.shape_cast %64 : vector<8x8xf32> to vector<8x8x1xf32>
    %66 = arith.truncf %63 : vector<8x8x8xf32> to vector<8x8x8xbf16>
    %cst_29 = arith.constant dense<0.000000e+00> : vector<8x8x16xf32>
    %67 = tpu.matmul %66, %55, %cst_29 {dimension_numbers = #tpu.dot_dimension_numbers<[2], [1], [1], [2], [0, 0, 0, 1, 1, 2], [0], [0]>} : vector<8x8x8xbf16>, vector<8x8x16xbf16>, vector<8x8x16xf32> -> vector<8x8x16xf32>
    %68 = tpu.reciprocal %65 {approx = true} : vector<8x8x1xf32> -> vector<8x8x1xf32>
    %69 = vector.broadcast %68 : vector<8x8x1xf32> to vector<8x8x16xf32>
    %70 = arith.mulf %67, %69 : vector<8x8x16xf32>
    %71 = arith.truncf %70 : vector<8x8x16xf32> to vector<8x8x16xbf16>
    %72 = vector.shape_cast %71 : vector<8x8x16xbf16> to vector<1x8x8x16xbf16>
    %73 = tpu.transpose %72, [0, 2, 1, 3] : vector<1x8x8x16xbf16> -> vector<1x8x8x16xbf16>
    %74 = vector.shape_cast %73 : vector<1x8x8x16xbf16> to vector<8x128xbf16>
    %c0_30 = arith.constant 0 : index
    %c0_31 = arith.constant 0 : index
    %75 = vector.load %arg10[%c0_30, %c0_31] : memref<128x128xbf16, #tpu.memory_space<vmem>>, vector<128x128xbf16>
    %cst_32 = arith.constant dense<0.000000e+00> : vector<8x128xf32>
    %76 = tpu.matmul %74, %75, %cst_32 {dimension_numbers = #tpu.dot_dimension_numbers<[1], [0], [0], [1], [0, 0, 1, 1], [], []>} : vector<8x128xbf16>, vector<128x128xbf16>, vector<8x128xf32> -> vector<8x128xf32>
    %c0_33 = arith.constant 0 : index
    %c0_34 = arith.constant 0 : index
    %77 = vector.load %arg11[%c0_33, %c0_34] : memref<1x128xf32, #tpu.memory_space<vmem>>, vector<1x128xf32>
    %78 = vector.broadcast %77 : vector<1x128xf32> to vector<8x128xf32>
    %79 = arith.addf %76, %78 : vector<8x128xf32>
    %cst_35 = arith.constant 1.000000e+00 : f32
    %80 = vector.broadcast %cst_35 : f32 to vector<8x128xf32>
    %81 = arith.mulf %80, %1 : vector<8x128xf32>
    %82 = arith.addf %79, %81 : vector<8x128xf32>
    %c0_36 = arith.constant 0 : index
    %c0_37 = arith.constant 0 : index
    %83 = vector.load %arg12[%c0_36, %c0_37] : memref<1x128xf32, #tpu.memory_space<vmem>>, vector<1x128xf32>
    %c0_38 = arith.constant 0 : index
    %c0_39 = arith.constant 0 : index
    %84 = vector.load %arg13[%c0_38, %c0_39] : memref<1x128xf32, #tpu.memory_space<vmem>>, vector<1x128xf32>
    %cst_40 = arith.constant dense<0.000000e+00> : vector<8xf32>
    %85 = vector.multi_reduction <add>, %82, %cst_40 [1] : vector<8x128xf32> to vector<8xf32>
    %86 = vector.shape_cast %85 : vector<8xf32> to vector<8x1xf32>
    %cst_41 = arith.constant 1.280000e+02 : f32
    %87 = vector.broadcast %cst_41 : f32 to vector<8x1xf32>
    %88 = arith.divf %86, %87 : vector<8x1xf32>
    %89 = vector.broadcast %88 : vector<8x1xf32> to vector<8x128xf32>
    %90 = arith.subf %82, %89 : vector<8x128xf32>
    %91 = vector.broadcast %88 : vector<8x1xf32> to vector<8x128xf32>
    %92 = arith.subf %82, %91 : vector<8x128xf32>
    %93 = arith.mulf %90, %92 : vector<8x128xf32>
    %cst_42 = arith.constant dense<0.000000e+00> : vector<8xf32>
    %94 = vector.multi_reduction <add>, %93, %cst_42 [1] : vector<8x128xf32> to vector<8xf32>
    %95 = vector.shape_cast %94 : vector<8xf32> to vector<8x1xf32>
    %cst_43 = arith.constant 1.280000e+02 : f32
    %96 = vector.broadcast %cst_43 : f32 to vector<8x1xf32>
    %97 = arith.divf %95, %96 : vector<8x1xf32>
    %98 = vector.broadcast %88 : vector<8x1xf32> to vector<8x128xf32>
    %99 = arith.subf %82, %98 : vector<8x128xf32>
    %cst_44 = arith.constant 9.99999974E-6 : f32
    %100 = vector.broadcast %cst_44 : f32 to vector<8x1xf32>
    %101 = arith.addf %97, %100 : vector<8x1xf32>
    %102 = math.rsqrt %101 : vector<8x1xf32>
    %103 = vector.broadcast %102 : vector<8x1xf32> to vector<8x128xf32>
    %104 = arith.mulf %99, %103 : vector<8x128xf32>
    %105 = vector.broadcast %83 : vector<1x128xf32> to vector<8x128xf32>
    %106 = arith.mulf %104, %105 : vector<8x128xf32>
    %107 = vector.broadcast %84 : vector<1x128xf32> to vector<8x128xf32>
    %108 = arith.addf %106, %107 : vector<8x128xf32>
    %109 = arith.truncf %108 : vector<8x128xf32> to vector<8x128xbf16>
    %c0_45 = arith.constant 0 : index
    %c0_46 = arith.constant 0 : index
    %110 = vector.load %arg14[%c0_45, %c0_46] : memref<128x256xbf16, #tpu.memory_space<vmem>>, vector<128x256xbf16>
    %cst_47 = arith.constant dense<0.000000e+00> : vector<8x256xf32>
    %111 = tpu.matmul %109, %110, %cst_47 {dimension_numbers = #tpu.dot_dimension_numbers<[1], [0], [0], [1], [0, 0, 1, 1], [], []>} : vector<8x128xbf16>, vector<128x256xbf16>, vector<8x256xf32> -> vector<8x256xf32>
    %c0_48 = arith.constant 0 : index
    %c0_49 = arith.constant 0 : index
    %112 = vector.load %arg15[%c0_48, %c0_49] : memref<1x256xf32, #tpu.memory_space<vmem>>, vector<1x256xf32>
    %113 = vector.broadcast %112 : vector<1x256xf32> to vector<8x256xf32>
    %114 = arith.addf %111, %113 : vector<8x256xf32>
    %cst_50 = arith.constant 5.000000e-01 : f32
    %115 = vector.broadcast %cst_50 : f32 to vector<8x256xf32>
    %116 = arith.mulf %115, %114 : vector<8x256xf32>
    %cst_51 = arith.constant 0.707106769 : f32
    %117 = vector.broadcast %cst_51 : f32 to vector<8x256xf32>
    %118 = arith.mulf %114, %117 : vector<8x256xf32>
    %cst_52 = arith.constant 0.000000e+00 : f32
    %119 = vector.broadcast %cst_52 : f32 to vector<8x256xf32>
    %120 = arith.cmpf oge, %118, %119 : vector<8x256xf32>
    %cst_53 = arith.constant 1.000000e+00 : f32
    %cst_54 = arith.constant -1.000000e+00 : f32
    %121 = vector.broadcast %cst_53 : f32 to vector<8x256xf32>
    %122 = vector.broadcast %cst_54 : f32 to vector<8x256xf32>
    %123 = arith.select %120, %121, %122 : vector<8x256xi1>, vector<8x256xf32>
    %124 = math.absf %118 : vector<8x256xf32>
    %cst_55 = arith.constant 0.327591091 : f32
    %125 = vector.broadcast %cst_55 : f32 to vector<8x256xf32>
    %126 = arith.mulf %125, %124 : vector<8x256xf32>
    %cst_56 = arith.constant 1.000000e+00 : f32
    %127 = vector.broadcast %cst_56 : f32 to vector<8x256xf32>
    %128 = arith.addf %127, %126 : vector<8x256xf32>
    %129 = tpu.reciprocal %128 {approx = true} : vector<8x256xf32> -> vector<8x256xf32>
    %cst_57 = arith.constant 1.06140542 : f32
    %130 = vector.broadcast %cst_57 : f32 to vector<8x256xf32>
    %131 = arith.mulf %130, %129 : vector<8x256xf32>
    %cst_58 = arith.constant -1.45315206 : f32
    %132 = vector.broadcast %cst_58 : f32 to vector<8x256xf32>
    %133 = arith.addf %131, %132 : vector<8x256xf32>
    %134 = arith.mulf %133, %129 : vector<8x256xf32>
    %cst_59 = arith.constant 1.42141378 : f32
    %135 = vector.broadcast %cst_59 : f32 to vector<8x256xf32>
    %136 = arith.addf %134, %135 : vector<8x256xf32>
    %137 = arith.mulf %136, %129 : vector<8x256xf32>
    %cst_60 = arith.constant -0.284496725 : f32
    %138 = vector.broadcast %cst_60 : f32 to vector<8x256xf32>
    %139 = arith.addf %137, %138 : vector<8x256xf32>
    %140 = arith.mulf %139, %129 : vector<8x256xf32>
    %cst_61 = arith.constant 0.254829586 : f32
    %141 = vector.broadcast %cst_61 : f32 to vector<8x256xf32>
    %142 = arith.addf %140, %141 : vector<8x256xf32>
    %143 = arith.mulf %142, %129 : vector<8x256xf32>
    %cst_62 = arith.constant 0.000000e+00 : f32
    %144 = vector.broadcast %cst_62 : f32 to vector<8x256xf32>
    %145 = arith.subf %144, %124 : vector<8x256xf32>
    %146 = arith.mulf %145, %124 : vector<8x256xf32>
    %147 = math.exp %146 : vector<8x256xf32>
    %148 = arith.mulf %143, %147 : vector<8x256xf32>
    %cst_63 = arith.constant 1.000000e+00 : f32
    %149 = vector.broadcast %cst_63 : f32 to vector<8x256xf32>
    %150 = arith.subf %149, %148 : vector<8x256xf32>
    %151 = arith.mulf %123, %150 : vector<8x256xf32>
    %cst_64 = arith.constant 1.000000e+00 : f32
    %152 = vector.broadcast %cst_64 : f32 to vector<8x256xf32>
    %153 = arith.addf %152, %151 : vector<8x256xf32>
    %154 = arith.mulf %116, %153 : vector<8x256xf32>
    %155 = arith.truncf %154 : vector<8x256xf32> to vector<8x256xbf16>
    %c0_65 = arith.constant 0 : index
    %c0_66 = arith.constant 0 : index
    %156 = vector.load %arg16[%c0_65, %c0_66] : memref<256x128xbf16, #tpu.memory_space<vmem>>, vector<256x128xbf16>
    %cst_67 = arith.constant dense<0.000000e+00> : vector<8x128xf32>
    %157 = tpu.matmul %155, %156, %cst_67 {dimension_numbers = #tpu.dot_dimension_numbers<[1], [0], [0], [1], [0, 0, 1, 1], [], []>} : vector<8x256xbf16>, vector<256x128xbf16>, vector<8x128xf32> -> vector<8x128xf32>
    %c0_68 = arith.constant 0 : index
    %c0_69 = arith.constant 0 : index
    %158 = vector.load %arg17[%c0_68, %c0_69] : memref<1x128xf32, #tpu.memory_space<vmem>>, vector<1x128xf32>
    %159 = vector.broadcast %158 : vector<1x128xf32> to vector<8x128xf32>
    %160 = arith.addf %157, %159 : vector<8x128xf32>
    %cst_70 = arith.constant 5.000000e-01 : f32
    %161 = vector.broadcast %cst_70 : f32 to vector<8x128xf32>
    %162 = arith.mulf %161, %160 : vector<8x128xf32>
    %cst_71 = arith.constant 0.707106769 : f32
    %163 = vector.broadcast %cst_71 : f32 to vector<8x128xf32>
    %164 = arith.mulf %160, %163 : vector<8x128xf32>
    %cst_72 = arith.constant 0.000000e+00 : f32
    %165 = vector.broadcast %cst_72 : f32 to vector<8x128xf32>
    %166 = arith.cmpf oge, %164, %165 : vector<8x128xf32>
    %cst_73 = arith.constant 1.000000e+00 : f32
    %cst_74 = arith.constant -1.000000e+00 : f32
    %167 = vector.broadcast %cst_73 : f32 to vector<8x128xf32>
    %168 = vector.broadcast %cst_74 : f32 to vector<8x128xf32>
    %169 = arith.select %166, %167, %168 : vector<8x128xi1>, vector<8x128xf32>
    %170 = math.absf %164 : vector<8x128xf32>
    %cst_75 = arith.constant 0.327591091 : f32
    %171 = vector.broadcast %cst_75 : f32 to vector<8x128xf32>
    %172 = arith.mulf %171, %170 : vector<8x128xf32>
    %cst_76 = arith.constant 1.000000e+00 : f32
    %173 = vector.broadcast %cst_76 : f32 to vector<8x128xf32>
    %174 = arith.addf %173, %172 : vector<8x128xf32>
    %175 = tpu.reciprocal %174 {approx = true} : vector<8x128xf32> -> vector<8x128xf32>
    %cst_77 = arith.constant 1.06140542 : f32
    %176 = vector.broadcast %cst_77 : f32 to vector<8x128xf32>
    %177 = arith.mulf %176, %175 : vector<8x128xf32>
    %cst_78 = arith.constant -1.45315206 : f32
    %178 = vector.broadcast %cst_78 : f32 to vector<8x128xf32>
    %179 = arith.addf %177, %178 : vector<8x128xf32>
    %180 = arith.mulf %179, %175 : vector<8x128xf32>
    %cst_79 = arith.constant 1.42141378 : f32
    %181 = vector.broadcast %cst_79 : f32 to vector<8x128xf32>
    %182 = arith.addf %180, %181 : vector<8x128xf32>
    %183 = arith.mulf %182, %175 : vector<8x128xf32>
    %cst_80 = arith.constant -0.284496725 : f32
    %184 = vector.broadcast %cst_80 : f32 to vector<8x128xf32>
    %185 = arith.addf %183, %184 : vector<8x128xf32>
    %186 = arith.mulf %185, %175 : vector<8x128xf32>
    %cst_81 = arith.constant 0.254829586 : f32
    %187 = vector.broadcast %cst_81 : f32 to vector<8x128xf32>
    %188 = arith.addf %186, %187 : vector<8x128xf32>
    %189 = arith.mulf %188, %175 : vector<8x128xf32>
    %cst_82 = arith.constant 0.000000e+00 : f32
    %190 = vector.broadcast %cst_82 : f32 to vector<8x128xf32>
    %191 = arith.subf %190, %170 : vector<8x128xf32>
    %192 = arith.mulf %191, %170 : vector<8x128xf32>
    %193 = math.exp %192 : vector<8x128xf32>
    %194 = arith.mulf %189, %193 : vector<8x128xf32>
    %cst_83 = arith.constant 1.000000e+00 : f32
    %195 = vector.broadcast %cst_83 : f32 to vector<8x128xf32>
    %196 = arith.subf %195, %194 : vector<8x128xf32>
    %197 = arith.mulf %169, %196 : vector<8x128xf32>
    %cst_84 = arith.constant 1.000000e+00 : f32
    %198 = vector.broadcast %cst_84 : f32 to vector<8x128xf32>
    %199 = arith.addf %198, %197 : vector<8x128xf32>
    %200 = arith.mulf %162, %199 : vector<8x128xf32>
    %cst_85 = arith.constant 1.000000e+00 : f32
    %201 = vector.broadcast %cst_85 : f32 to vector<8x128xf32>
    %202 = arith.mulf %201, %82 : vector<8x128xf32>
    %203 = arith.addf %200, %202 : vector<8x128xf32>
    %204 = vector.shape_cast %203 : vector<8x128xf32> to vector<1x8x128xf32>
    %c0_86 = arith.constant 0 : index
    %c0_87 = arith.constant 0 : index
    %c0_88 = arith.constant 0 : index
    %205 = vector.load %arg18[%c0_86, %c0_87, %c0_88] : memref<1x8x128xf32, #tpu.memory_space<vmem>>, vector<1x8x128xf32>
    tpu.vector_store %arg18[%c0_86, %c0_87, %c0_88], %204 {strides = array<i32>} : memref<1x8x128xf32, #tpu.memory_space<vmem>>, vector<1x8x128xf32>,
    return
  }
  func.func @transform_0(%arg0: i32) -> (i32, i32, i32) {
    %c0_i32 = arith.constant 0 : i32
    %c0_i32_0 = arith.constant 0 : i32
    %c0_i32_1 = arith.constant 0 : i32
    return %arg0, %c0_i32, %c0_i32_0 : i32, i32, i32
  }
  func.func @transform_1(%arg0: i32) -> (i32, i32) {
    %c0_i32 = arith.constant 0 : i32
    %c0_i32_0 = arith.constant 0 : i32
    %c0_i32_1 = arith.constant 0 : i32
    return %c0_i32, %c0_i32_0 : i32, i32
  }
  func.func @transform_2(%arg0: i32) -> (i32, i32) {
    %c0_i32 = arith.constant 0 : i32
    %c0_i32_0 = arith.constant 0 : i32
    %c0_i32_1 = arith.constant 0 : i32
    return %c0_i32, %c0_i32_0 : i32, i32
  }
  func.func @transform_3(%arg0: i32) -> (i32, i32) {
    %c0_i32 = arith.constant 0 : i32
    %c0_i32_0 = arith.constant 0 : i32
    %c0_i32_1 = arith.constant 0 : i32
    return %c0_i32, %c0_i32_0 : i32, i32
  }
  func.func @transform_4(%arg0: i32) -> (i32, i32) {
    %c0_i32 = arith.constant 0 : i32
    %c0_i32_0 = arith.constant 0 : i32
    %c0_i32_1 = arith.constant 0 : i32
    return %c0_i32, %c0_i32_0 : i32, i32
  }
  func.func @transform_5(%arg0: i32) -> (i32, i32) {
    %c0_i32 = arith.constant 0 : i32
    %c0_i32_0 = arith.constant 0 : i32
    %c0_i32_1 = arith.constant 0 : i32
    return %c0_i32, %c0_i32_0 : i32, i32
  }
  func.func @transform_6(%arg0: i32) -> (i32, i32) {
    %c0_i32 = arith.constant 0 : i32
    %c0_i32_0 = arith.constant 0 : i32
    %c0_i32_1 = arith.constant 0 : i32
    return %c0_i32, %c0_i32_0 : i32, i32
  }
  func.func @transform_7(%arg0: i32) -> (i32, i32) {
    %c0_i32 = arith.constant 0 : i32
    %c0_i32_0 = arith.constant 0 : i32
    %c0_i32_1 = arith.constant 0 : i32
    return %c0_i32, %c0_i32_0 : i32, i32
  }
  func.func @transform_8(%arg0: i32) -> (i32, i32) {
    %c0_i32 = arith.constant 0 : i32
    %c0_i32_0 = arith.constant 0 : i32
    %c0_i32_1 = arith.constant 0 : i32
    return %c0_i32, %c0_i32_0 : i32, i32
  }
  func.func @transform_9(%arg0: i32) -> (i32, i32) {
    %c0_i32 = arith.constant 0 : i32
    %c0_i32_0 = arith.constant 0 : i32
    %c0_i32_1 = arith.constant 0 : i32
    return %c0_i32, %c0_i32_0 : i32, i32
  }
  func.func @transform_10(%arg0: i32) -> (i32, i32) {
    %c0_i32 = arith.constant 0 : i32
    %c0_i32_0 = arith.constant 0 : i32
    %c0_i32_1 = arith.constant 0 : i32
    return %c0_i32, %c0_i32_0 : i32, i32
  }
  func.func @transform_11(%arg0: i32) -> (i32, i32) {
    %c0_i32 = arith.constant 0 : i32
    %c0_i32_0 = arith.constant 0 : i32
    %c0_i32_1 = arith.constant 0 : i32
    return %c0_i32, %c0_i32_0 : i32, i32
  }
  func.func @transform_12(%arg0: i32) -> (i32, i32) {
    %c0_i32 = arith.constant 0 : i32
    %c0_i32_0 = arith.constant 0 : i32
    %c0_i32_1 = arith.constant 0 : i32
    return %c0_i32, %c0_i32_0 : i32, i32
  }
  func.func @transform_13(%arg0: i32) -> (i32, i32) {
    %c0_i32 = arith.constant 0 : i32
    %c0_i32_0 = arith.constant 0 : i32
    %c0_i32_1 = arith.constant 0 : i32
    return %c0_i32, %c0_i32_0 : i32, i32
  }
  func.func @transform_14(%arg0: i32) -> (i32, i32) {
    %c0_i32 = arith.constant 0 : i32
    %c0_i32_0 = arith.constant 0 : i32
    %c0_i32_1 = arith.constant 0 : i32
    return %c0_i32, %c0_i32_0 : i32, i32
  }
  func.func @transform_15(%arg0: i32) -> (i32, i32) {
    %c0_i32 = arith.constant 0 : i32
    %c0_i32_0 = arith.constant 0 : i32
    %c0_i32_1 = arith.constant 0 : i32
    return %c0_i32, %c0_i32_0 : i32, i32
  }
  func.func @transform_16(%arg0: i32) -> (i32, i32) {
    %c0_i32 = arith.constant 0 : i32
    %c0_i32_0 = arith.constant 0 : i32
    %c0_i32_1 = arith.constant 0 : i32
    return %c0_i32, %c0_i32_0 : i32, i32
  }
  func.func @transform_17(%arg0: i32) -> (i32, i32, i32) {
    %c0_i32 = arith.constant 0 : i32
    %c0_i32_0 = arith.constant 0 : i32
    %c0_i32_1 = arith.constant 0 : i32
    return %arg0, %c0_i32, %c0_i32_0 : i32, i32, i32
  }
}

</mosaic_0001>

<bundles_post_ra>
// kernel: tpu_custom_call.1
= control target key start
LH: loop header
LB: loop body
LE: loop exit
PB: predicated region body
PF: predicated region fallthrough
CT: control target
= control target key end

     0   :  { %s5170_s0 = inlined_call_operand.hbm [shape: f32[2,8,128], index: 0, kind: input, shape index: {}]   ;;  %s5171_s1 = inlined_call_operand.vmem [shape: f32[1,128], index: 1, kind: input, shape index: {}]   ;;  %s5172_s2 = inlined_call_operand.vmem [shape: f32[1,128], index: 2, kind: input, shape index: {}]   ;;  %s5173_s3 = inlined_call_operand.hbm [shape: bf16[128,128], index: 3, kind: input, shape index: {}]   ;;  %s5174_s4 = inlined_call_operand.vmem [shape: f32[1,128], index: 4, kind: input, shape index: {}]   ;;  %s5175_s5 = inlined_call_operand.hbm [shape: bf16[128,128], index: 5, kind: input, shape index: {}]   ;;  %s5176_s6 = inlined_call_operand.vmem [shape: f32[1,128], index: 6, kind: input, shape index: {}]   ;;  %s5177_s7 = inlined_call_operand.hbm [shape: bf16[128,128], index: 7, kind: input, shape index: {}]   ;;  %s5178_s8 = inlined_call_operand.vmem [shape: f32[1,128], index: 8, kind: input, shape index: {}]   ;;  %s5179_s9 = inlined_call_operand.hbm [shape: bf16[128,128], index: 9, kind: input, shape index: {}]   ;;  %s5180_s10 = inlined_call_operand.vmem [shape: f32[1,128], index: 10, kind: input, shape index: {}]   ;;  %s5181_s11 = inlined_call_operand.vmem [shape: f32[1,128], index: 11, kind: input, shape index: {}]   ;;  %s5182_s12 = inlined_call_operand.vmem [shape: f32[1,128], index: 12, kind: input, shape index: {}]   ;;  %s5183_s13 = inlined_call_operand.hbm [shape: bf16[128,256], index: 13, kind: input, shape index: {}]   ;;  %s5184_s14 = inlined_call_operand.vmem [shape: f32[1,256], index: 14, kind: input, shape index: {}]   ;;  %s5185_s15 = inlined_call_operand.hbm [shape: bf16[256,128], index: 15, kind: input, shape index: {}]   ;;  %s5186_s16 = inlined_call_operand.vmem [shape: f32[1,128], index: 16, kind: input, shape index: {}]   ;;  %s5187_s17 = inlined_call_operand.hbm [shape: f32[2,8,128], index: 17, kind: output, shape index: {}]  }
   0x1   :  { %5197 = sst [smem:[#allocation20_spill]] %s5170_s0 }
   0x2   :  { %5198 = sst [smem:[#allocation21_spill]] %s5171_s1 }
   0x3   :  { %5199 = sst [smem:[#allocation22_spill]] %s5173_s3 }
   0x4   :  { %5200 = sst [smem:[#allocation23_spill]] %s5177_s7 }
   0x5   :  { %5201 = sst [smem:[#allocation24_spill]] %s5178_s8 }
   0x6   :  { %5202 = sst [smem:[#allocation25_spill]] %s5180_s10 }
   0x7   :  { %5203 = sst [smem:[#allocation26_spill]] %s5181_s11 }
   0x8   :  { %5204 = sst [smem:[#allocation27_spill]] %s5182_s12 }
   0x9   :  { %5205 = sst [smem:[#allocation28_spill]] %s5184_s14 }
   0xa   :  { %5206 = sst [smem:[#allocation29_spill]] %s5186_s16 }
   0xb   :  { %5207 = sst [smem:[#allocation30_spill]] %s5187_s17 }
   0xc   :  { %22 = vsyncpa [#allocation3], 0 }
   0xd   :  { %24 = vsyncpa [#allocation3 + $0x1], 0 }
   0xe   :  { %25 = vsyncpa [#allocation6], 0 }
   0xf   :  { %26 = vsyncpa [#allocation9], 0 }
  0x10   :  { %27 = vsyncpa [#allocation12], 0 }
  0x11   :  { %28 = vsyncpa [#allocation4], 0 }
  0x12   :  { %30 = vsyncpa [#allocation4 + $0x1], 0  ;;  %s4447_s24 = smov 0   ;;  %s4449_s25 = smov 0  }
  0x13   :  { %s4451_s26 = smov 0   ;;  %s4453_s27 = smov 0  }
  0x14 LB: > { %s4332_s28 = smov [#allocation5]   ;;  %s4468_s0 = sadd.s32 4294967295, %s4330_s27   ;;  %s4330_s27 = sphi %s4453_s27, %s5243_s27   ;;  %s4326_s26 = sphi %s4451_s26, %s5242_s26   ;;  %s4322_s25 = sphi %s4449_s25, %s5241_s25   ;;  %s4318_s24 = sphi %s4447_s24, %s5240_s24  }
  0x15   : > { %s447_s29 = sshll.u32 %s4332_s28, 4  ;;  %p3427_p0 = scmp.ge.s32.totalorder %s4330_s27, 1  ;;  %s4473_s29 = int_to_ptr.vmem [resolvable:$true] %s447_s29 }
  0x16   : > { %p5194_p1 = scmp.eq.s32.totalorder %s4468_s0, 0  ;;  %p429_p2 = scmp.lt.s32.totalorder %s4330_s27, 3 }
  0x17   : > { %s4333_s18 = smov [#allocation8]   ;;  %s4334_s20 = smov [#allocation11]  }
  0x18   : > { %p4475_p3 = pnand %p3427_p0, %p429_p2  ;;  %s479_s19 = sshll.u32 %s4333_s18, 4  ;;  %s4488_s19 = int_to_ptr.vmem [resolvable:$true] %s479_s19 }
  0x19   : > { %s517_s21 = sshll.u32 %s4334_s20, 4  ;;  %s5210_s3 = sld [smem:[#allocation22_spill]]  ;;  %s4490_s21 = int_to_ptr.vmem [resolvable:$true] %s517_s21 }
  0x1a   : > { %s5208_s30 = scalar_select %p4475_p3, 1, 0 }
  0x1b   : > { %p3837_p5 = pneg %p4475_p3 }
  0x1d   : > { %p4484_p6 = pnand %p3837_p5, %p5194_p1 }
  0x1f   : > { %s4054_s28 = scalar_lea.hbm %s5210_s3, 1024  ;;  %p4500_p8 = pneg %p4484_p6 }
  0x20   : > { %p4055_p7 = scmp.ne.s32.totalorder %s5210_s3, %s4054_s28  ;;  %p4061_p11 = scmp.lt.u32.totalorder %s4054_s28, %s5210_s3 }
  0x22   : > { %p4057_p9 = pnand %p4500_p8, %p4055_p7 }
  0x24   : > { %p4058_p10 = pneg %p4057_p9 }
  0x26   : > { %p4063_p12 = pnand %p4061_p11, %p4058_p10 }
  0x28   : > { %4066 = shalt.err (!%p4063_p12)
}
  0x29   : > { %s4067_s16 = scalar_lea.vmem %s4473_s29, 1024  ;;  %p4075_p5 = scmp.lt.s32.totalorder %s4473_s29, %s4473_s29 }
  0x2a   : > { %p4068_p13 = scmp.ne.s32.totalorder %s4473_s29, %s4067_s16  ;;  %p4076_p4 = scmp.lt.s32.totalorder %s4067_s16, %s4067_s16 }
  0x2c   : > { %p4070_p0 = pnand %p4068_p13, %p4500_p8  ;;  %p4077_p7 = por %p4076_p4, %p4075_p5 }
  0x2e   : > { %p4071_p2 = pneg %p4070_p0 }
  0x30   : > { %p4078_p9 = pnand %p4077_p7, %p4071_p2 }
  0x32   : > { %4081 = shalt.err (!%p4078_p9)
}
  0x33   : > { %s5190_s17 = smov 64   ;;  %s5192_s14 = smov 4  }
  0x34   : > { %3840 = dma.hbm_to_vmem [thread:$0]  (!%p4484_p6), %s5210_s3, 1024, %s4473_s29, [#allocation6], %s5190_s17, %s5190_s17, %s5192_s14  }
  0x35   : > { %s5212_s7 = sld [smem:[#allocation23_spill]] }
  0x3b   : > { %s4082_s16 = scalar_lea.hbm %s5212_s7, 1024 }
  0x3c   : > { %p4083_p4 = scmp.ne.s32.totalorder %s5212_s7, %s4082_s16  ;;  %p4089_p12 = scmp.lt.u32.totalorder %s4082_s16, %s5212_s7 }
  0x3e   : > { %p4085_p10 = pnand %p4083_p4, %p4500_p8 }
  0x40   : > { %p4086_p11 = pneg %p4085_p10 }
  0x42   : > { %p4091_p13 = pnand %p4089_p12, %p4086_p11 }
  0x44   : > { %4094 = shalt.err (!%p4091_p13)
}
  0x45   : > { %s4095_s29 = scalar_lea.vmem %s4488_s19, 1024  ;;  %p4103_p7 = scmp.lt.s32.totalorder %s4488_s19, %s4488_s19 }
  0x46   : > { %p4096_p0 = scmp.ne.s32.totalorder %s4488_s19, %s4095_s29  ;;  %p4104_p9 = scmp.lt.s32.totalorder %s4095_s29, %s4095_s29 }
  0x48   : > { %p4098_p2 = pnand %p4096_p0, %p4500_p8  ;;  %p4105_p4 = por %p4104_p9, %p4103_p7 }
  0x4a   : > { %p4099_p5 = pneg %p4098_p2 }
  0x4c   : > { %p4106_p10 = pnand %p4105_p4, %p4099_p5 }
  0x4e   : > { %4109 = shalt.err (!%p4106_p10)
}
  0x4f   : > { %3846 = dma.hbm_to_vmem [thread:$0]  (!%p4484_p6), %s5212_s7, 1024, %s4488_s19, [#allocation9], %s5190_s17, %s5190_s17, %s5192_s14  }
  0x50   : > { %s4110_s22 = scalar_lea.hbm %s5183_s13, 2048 }
  0x51   : > { %p4111_p11 = scmp.ne.s32.totalorder %s5183_s13, %s4110_s22  ;;  %p4117_p0 = scmp.lt.u32.totalorder %s4110_s22, %s5183_s13 }
  0x53   : > { %p4113_p12 = pnand %p4111_p11, %p4500_p8 }
  0x55   : > { %p4114_p13 = pneg %p4113_p12 }
  0x57   : > { %p4119_p2 = pnand %p4117_p0, %p4114_p13 }
  0x59   : > { %4122 = shalt.err (!%p4119_p2)
}
  0x5a   : > { %s4123_s19 = scalar_lea.vmem %s4490_s21, 2048  ;;  %p4131_p4 = scmp.lt.s32.totalorder %s4490_s21, %s4490_s21 }
  0x5b   : > { %p4124_p5 = scmp.ne.s32.totalorder %s4490_s21, %s4123_s19  ;;  %p4132_p10 = scmp.lt.s32.totalorder %s4123_s19, %s4123_s19 }
  0x5d   : > { %p4126_p7 = pnand %p4124_p5, %p4500_p8  ;;  %p4133_p11 = por %p4132_p10, %p4131_p4 }
  0x5f   : > { %p4127_p9 = pneg %p4126_p7 }
  0x61   : > { %p4134_p12 = pnand %p4133_p11, %p4127_p9 }
  0x63   : > { %4137 = shalt.err (!%p4134_p12)
}
  0x64   : > { %s4337_s29 = smov 128   ;;  %s4338_s8 = smov 8  }
  0x65   : > { %3852 = dma.hbm_to_vmem [thread:$0]  (!%p4484_p6), %s5183_s13, 2048, %s4490_s21, [#allocation12], %s4337_s29, %s4337_s29, %s4338_s8  }
  0x66   : > { %s4339_s12 = smov [#allocation7]   ;;  %s4340_s23 = smov [#allocation10]  }
  0x67   : > { %s463_s22 = sshll.u32 %s4339_s12, 4  ;;  %s495_s28 = sshll.u32 %s4340_s23, 4  ;;  %s464_s22 = int_to_ptr.vmem [resolvable:$true] %s463_s22  ;;  %s496_s28 = int_to_ptr.vmem [resolvable:$true] %s495_s28 }
  0x68   : > { %s4138_s19 = scalar_lea.hbm %s5175_s5, 1024 }
  0x69   : > { %p4139_p13 = scmp.ne.s32.totalorder %s5175_s5, %s4138_s19  ;;  %p4145_p5 = scmp.lt.u32.totalorder %s4138_s19, %s5175_s5 }
  0x6b   : > { %p4141_p0 = pnand %p4139_p13, %p4500_p8 }
  0x6d   : > { %p4142_p2 = pneg %p4141_p0 }
  0x6f   : > { %p4147_p7 = pnand %p4145_p5, %p4142_p2 }
  0x71   : > { %4150 = shalt.err (!%p4147_p7)
}
  0x72   : > { %s4151_s21 = scalar_lea.vmem %s464_s22, 1024  ;;  %p4159_p11 = scmp.lt.s32.totalorder %s464_s22, %s464_s22 }
  0x73   : > { %p4152_p9 = scmp.ne.s32.totalorder %s464_s22, %s4151_s21  ;;  %p4160_p12 = scmp.lt.s32.totalorder %s4151_s21, %s4151_s21 }
  0x75   : > { %p4154_p4 = pnand %p4152_p9, %p4500_p8  ;;  %p4161_p1 = por %p4160_p12, %p4159_p11 }
  0x77   : > { %p4155_p10 = pneg %p4154_p4 }
  0x79   : > { %p4162_p3 = pnand %p4161_p1, %p4155_p10 }
  0x7b   : > { %4165 = shalt.err (!%p4162_p3)
}
  0x7c   : > { %s5213_s17 = smov 4   ;;  %s5214_s14 = smov 64  }
  0x7d   : > { %3843 = dma.hbm_to_vmem [thread:$0]  (!%p4484_p6), %s5175_s5, 1024, %s464_s22, [#allocation6], %s5214_s14, %s5214_s14, %s5213_s17  }
  0x7e   : > { %s4166_s10 = scalar_lea.hbm %s5179_s9, 1024 }
  0x7f   : > { %p4167_p1 = scmp.ne.s32.totalorder %s5179_s9, %s4166_s10  ;;  %p4173_p0 = scmp.lt.u32.totalorder %s4166_s10, %s5179_s9 }
  0x81   : > { %p4169_p3 = pnand %p4167_p1, %p4500_p8 }
  0x83   : > { %p4170_p13 = pneg %p4169_p3 }
  0x85   : > { %p4175_p2 = pnand %p4173_p0, %p4170_p13 }
  0x87   : > { %4178 = shalt.err (!%p4175_p2)
}
  0x88   : > { %s4179_s16 = scalar_lea.vmem %s496_s28, 1024  ;;  %p4187_p4 = scmp.lt.s32.totalorder %s496_s28, %s496_s28 }
  0x89   : > { %p4180_p5 = scmp.ne.s32.totalorder %s496_s28, %s4179_s16  ;;  %p4188_p10 = scmp.lt.s32.totalorder %s4179_s16, %s4179_s16 }
  0x8b   : > { %p4182_p7 = pnand %p4180_p5, %p4500_p8  ;;  %p4189_p11 = por %p4188_p10, %p4187_p4 }
  0x8d   : > { %p4183_p9 = pneg %p4182_p7 }
  0x8f   : > { %p4190_p12 = pnand %p4189_p11, %p4183_p9 }
  0x91   : > { %4193 = shalt.err (!%p4190_p12)
}
  0x92   : > { %3849 = dma.hbm_to_vmem [thread:$0]  (!%p4484_p6), %s5179_s9, 1024, %s496_s28, [#allocation9], %s5214_s14, %s5214_s14, %s5213_s17  }
  0x93   : > { %s4341_s21 = smov [#allocation13]   ;;  %s4194_s8 = scalar_lea.hbm %s5185_s15, 2048 }
  0x94   : > { %s533_s3 = sshll.u32 %s4341_s21, 4  ;;  %p4195_p1 = scmp.ne.s32.totalorder %s5185_s15, %s4194_s8  ;;  %s534_s3 = int_to_ptr.vmem [resolvable:$true] %s533_s3 }
  0x95   : > { %p4201_p0 = scmp.lt.u32.totalorder %s4194_s8, %s5185_s15 }
  0x96   : > { %p4197_p3 = pnand %p4195_p1, %p4500_p8 }
  0x98   : > { %p4198_p13 = pneg %p4197_p3 }
  0x9a   : > { %p4203_p2 = pnand %p4201_p0, %p4198_p13 }
  0x9c   : > { %4206 = shalt.err (!%p4203_p2)
}
  0x9d   : > { %s4207_s28 = scalar_lea.vmem %s534_s3, 2048  ;;  %p4215_p4 = scmp.lt.s32.totalorder %s534_s3, %s534_s3 }
  0x9e   : > { %p4208_p5 = scmp.ne.s32.totalorder %s534_s3, %s4207_s28  ;;  %p4216_p10 = scmp.lt.s32.totalorder %s4207_s28, %s4207_s28 }
  0xa0   : > { %p4210_p7 = pnand %p4208_p5, %p4500_p8  ;;  %p4217_p11 = por %p4216_p10, %p4215_p4 }
  0xa2   : > { %p4211_p9 = pneg %p4210_p7 }
  0xa4   : > { %p4218_p12 = pnand %p4217_p11, %p4211_p9 }
  0xa6   : > { %4221 = shalt.err (!%p4218_p12)
}
  0xa7   : > { %3855 = dma.hbm_to_vmem [thread:$0]  (!%p4484_p6), %s5185_s15, 2048, %s534_s3, [#allocation12], %s5214_s14, %s5214_s14, %s5213_s17  }
  0xa8   : > { %s3426_s1 = sadd.s32 4294967294, %s4330_s27   ;;  %s4638_s18 = sadd.s32 1, %s4330_s27  }
  0xa9   : > { %s40_s22 = ssub.s32 %s4330_s27, %s4638_s18  ;;  %s43_s19 = sadd.s32 1, %s4326_s26 }
  0xaa   : > { %p41_p8 = scmp.eq.s32.totalorder %s40_s22, 0  ;;  %p50_p1 = scmp.ne.s32.totalorder %s4326_s26, %s4322_s25 }
  0xab   : > { %p51_p3 = scmp.eq.s32.totalorder %s4330_s27, 0  ;;  %p56_p13 = scmp.ne.s32.totalorder %s4322_s25, %s4318_s24 }
  0xac   : > { %s4649_s21 = scalar_select %p41_p8, %s4326_s26, %s43_s19  }
  0xad   : > { %p4651_p0 = por %p51_p3, %p50_p1  ;;  %p5216_p2 = scmp.eq.s32.totalorder %s4468_s0, 0 }
  0xae   : > { %p416_p5 = scmp.eq.s32.totalorder %s4468_s0, 1  ;;  %p422_p7 = scmp.eq.s32.totalorder %s3426_s1, 1 }
  0xaf   : > { %p4657_p6 = por %p5216_p2, %p56_p13  ;;  %p3870_p9 = scmp.lt.s32.totalorder %s4330_s27, 2 }
  0xb0   : > { %s550_s14 = sand.u32 1, %s4326_s26   ;;  %p4664_p4 = por %p416_p5, %p50_p1 }
  0xb1   : > { %p4668_p10 = por %p422_p7, %p56_p13  ;;  %s3435_s8 = sshll.u32 %s550_s14, 3 }
  0xb2   : > { %s5218_s3 = scalar_select %p4664_p4, 1, 0 }
  0xb3   : > { %s5219_s29 = scalar_select %p4668_p10, 1, 0 }
  0xb4   : > { %s3436_s10 = sshll.u32 %s4330_s27, 7  ;;  %s5220_s23 = sld [smem:[#allocation20_spill]] }
  0xb5   : > { %s554_s20 = scalar_lea.vmem [#allocation2], %s3435_s8  ;;  %p4682_p11 = pnand %p3870_p9, %p4651_p0 }
  0xb6   : > { %s561_s16 = sshll.u32 %s554_s20, 4  ;;  %s551_s22 = scalar_lea.sflag [#allocation3], %s550_s14  ;;  %s4678_s16 = int_to_ptr.vmem [resolvable:$true] %s561_s16 }
  0xb7   : > { %p4224_p8 = pneg %p4682_p11 }
  0xba   : > { %s4676_s28 = scalar_lea.hbm %s5220_s23, %s3436_s10  ;;  %s4227_s11 = scalar_lea.hbm %s5220_s23, 256 }
  0xbb   : > { %s4222_s19 = scalar_lea.hbm %s4676_s28, 128  ;;  %p4228_p13 = scmp.lt.u32.totalorder %s4676_s28, %s5220_s23 }
  0xbc   : > { %p4223_p12 = scmp.ne.s32.totalorder %s4676_s28, %s4222_s19  ;;  %p4229_p0 = scmp.lt.u32.totalorder %s4227_s11, %s4222_s19 }
  0xbd   : > { %p4231_p5 = scmp.lt.u32.totalorder %s4222_s19, %s4676_s28 }
  0xbe   : > { %p4225_p1 = pnand %p4224_p8, %p4223_p12  ;;  %p4230_p2 = por %p4229_p0, %p4228_p13 }
  0xc0   : > { %p4226_p3 = pneg %p4225_p1  ;;  %p4232_p7 = por %p4231_p5, %p4230_p2 }
  0xc2   : > { %p4233_p9 = pnand %p4232_p7, %p4226_p3 }
  0xc4   : > { %4236 = shalt.err (!%p4233_p9)
}
  0xc5   : > { %s4237_s14 = scalar_lea.vmem %s4678_s16, 128  ;;  %s4342_s20 = smov [#allocation2]  }
  0xc6   : > { %p4238_p12 = scmp.ne.s32.totalorder %s4678_s16, %s4237_s14  ;;  %s4242_s8 = sshll.u32 %s4342_s20, 4  ;;  %s4243_s8 = int_to_ptr.vmem [resolvable:$false] %s4242_s8 }
  0xc7   : > { %s4244_s10 = scalar_lea.vmem %s4243_s8, 256  ;;  %p4245_p4 = scmp.lt.s32.totalorder %s4678_s16, %s4243_s8 }
  0xc8   : > { %p4240_p1 = pnand %p4238_p12, %p4224_p8  ;;  %p4246_p13 = scmp.lt.s32.totalorder %s4244_s10, %s4237_s14 }
  0xca   : > { %p4241_p10 = pneg %p4240_p1  ;;  %p4247_p0 = por %p4246_p13, %p4245_p4 }
  0xcc   : > { %p4248_p2 = pnand %p4247_p0, %p4241_p10 }
  0xce   : > { %4251 = shalt.err (!%p4248_p2)
}
  0xcf   : > { %3859 = dma.hbm_to_vmem [thread:$0]  (!%p4682_p11), %s4676_s28, 128, %s4678_s16, %s551_s22  }
  0xd0   : > { %p5222_p3 = scmp.ne.s32.totalorder %s5208_s30, 0 }
  0xd1   : > { %s4714_s19 = sand.u32 (!%p5222_p3), 1, %s4322_s25  }
  0xd2   : > { %570 = sbr.rel (%p5222_p3) target bundleno = 2827 (0xb0b), region = 88  ;;  %s3438_s11 = sshll.u32 (!%p5222_p3), %s4714_s19, 3 }
  0xd3   : > { %s573_s7 = scalar_lea.sflag (!%p5222_p3), [#allocation3], %s4714_s19  ;;  %s4720_s12 = scalar_lea.vmem (!%p5222_p3), [#allocation2], %s3438_s11 }
  0xd9   : > { %4297 = dma.done.wait (%p4657_p6), %s573_s7, 128  }
  0xda   : > { %4299 = vsyncadd (%p4657_p6), %s573_s7, 4294967168  ;;  %p5223_p4 = scmp.eq.s32.totalorder %s4468_s0, 0 }
  0xdc   : > { %4301 = dma.done.wait (%p5223_p4), [#allocation6], 2048   ;;  %p5224_p10 = pmov %p5223_p4 }
  0xdd   : > { %p5225_p11 = pmov %p5223_p4 }
  0xde   : > { %4303 = vsyncadd (%p5224_p10), [#allocation6], 4294965248 }
  0xdf   : > { %4305 = dma.done.wait (%p5225_p11), [#allocation9], 2048   ;;  %p5226_p8 = pmov %p5223_p4 }
  0xe0   : > { %p5227_p5 = pmov %p5223_p4 }
  0xe1   : > { %4307 = vsyncadd (%p5226_p8), [#allocation9], 4294965248 }
  0xe2   : > { %4309 = dma.done.wait (%p5227_p5), [#allocation12], 4096   ;;  %p5228_p7 = pmov %p5223_p4 }
  0xe3   : > { %v652_v0 = vld [vmem:[%s4720_s12] sm:$0xff]  ;;  %v3933_v1 = vld [vmem:[#allocation5] sm:$0xff]   ;;  %v4343_v3 = vmov 0.0   ;;  %v3935_v4 = vld [vmem:[#allocation5 + $0x8] sm:$0xff]   ;;  %vm4344_vm0 = vmmov 0   ;;  %s5229_s28 = sld [smem:[#allocation21_spill]] }
  0xe4   : > { %4311 = vsyncadd (%p5228_p7), [#allocation12], 4294963200  ;;  %655 = vadd.xlane.f32.xlu0 %v652_v0  ;;  %v3934_v2 = vld [vmem:[#allocation7] sm:$0xff]   ;;  %3633 = vmatprep.subr.bf16.mxu0 %v4343_v3  ;;  %v3936_v5 = vld [vmem:[#allocation7 + $0x8] sm:$0xff]   ;;  %s4345_s10 = smov 80   ;;  %s4346_s7 = smov 112  }
  0xe5   : > { %3653 = vmatprep.subr.bf16.mxu1 %v4343_v3  ;;  %3634 = vmatpush3.bf16.msra.mxu0 %v3933_v1  ;;  %v3937_v6 = vld [vmem:[#allocation5 + $0x10] sm:$0xff]   ;;  %v3939_v12 = vld [vmem:[#allocation5 + $0x18] sm:$0xff]   ;;  %v3941_v14 = vld [vmem:[#allocation5 + $0x20] sm:$0xff]   ;;  %s4347_s30 = smov 96   ;;  %s4348_s17 = smov 64   ;;  %vm1660_vm1 = vcmask 130048  }
  0xe6   : > { %3654 = vmatpush3.bf16.msra.mxu1 %v3934_v2  ;;  %3635 = vmatprep.subr.bf16.mxu0 %v4343_v3  ;;  %v3938_v11 = vld [vmem:[#allocation7 + $0x10] sm:$0xff]   ;;  %v3940_v13 = vld [vmem:[#allocation7 + $0x18] sm:$0xff]   ;;  %v3942_v15 = vld [vmem:[#allocation7 + $0x20] sm:$0xff]   ;;  %s4350_s16 = smov 16   ;;  %s4351_s1 = smov 32   ;;  %v1042_v2 = vlaneseq  ;;  %vm2037_vm2 = vcmask 64512  }
  0xe7   : > { %3655 = vmatprep.subr.bf16.mxu1 %v4343_v3  ;;  %3649 = vmatprep.mubr.msk.bf16.mxu0 %vm4344_vm0, %v4343_v3  ;;  %v3943_v16 = vld [vmem:[#allocation5 + $0x28] sm:$0xff]   ;;  %v3945_v18 = vld [vmem:[#allocation5 + $0x30] sm:$0xff]   ;;  %v3947_v20 = vld [vmem:[#allocation5 + $0x38] sm:$0xff]   ;;  %s5230_s20 = sld [smem:[#allocation24_spill]]  ;;  %vm2121_vm3 = vcmask 1043456   ;;  %vm2720_vm4 = vcmask 261120  }
  0xe8   : > { %3669 = vmatprep.mubr.msk.bf16.mxu1 %vm4344_vm0, %v4343_v3  ;;  %v3944_v17 = vld [vmem:[#allocation7 + $0x28] sm:$0xff]   ;;  %v3946_v19 = vld [vmem:[#allocation7 + $0x30] sm:$0xff]   ;;  %v3948_v21 = vld [vmem:[#allocation7 + $0x38] sm:$0xff]   ;;  %vm2723_vm5 = vcmask 392192   ;;  %vm2726_vm6 = vcmask 523264   ;;  %vm2729_vm7 = vcmask 654336  }
  0xe9   : > { %3636 = vmatpush3.bf16.msra.mxu0 %v3935_v4  ;;  %v3446_v26 = vld [vmem:[%s5229_s28] ss:$0 sm:$0xff]  ;;  %v3949_v31 = vld [vmem:[#allocation8] sm:$0xff]   ;;  %v3950_v33 = vld [vmem:[#allocation8 + $0x8] sm:$0xff]   ;;  %s4349_s28 = smov 48   ;;  %vm2732_vm8 = vcmask 785408  }
  0xea   : > { %3656 = vmatpush3.bf16.msra.mxu1 %v3936_v5  ;;  %3637 = vmatprep.subr.bf16.mxu0 %v4343_v3  ;;  %v3447_v28 = vld [vmem:[%s5172_s2] ss:$0 sm:$0xff]  ;;  %v3952_v35 = vld [vmem:[#allocation8 + $0x18] sm:$0xff]   ;;  %v3953_v36 = vld [vmem:[#allocation8 + $0x20] sm:$0xff]   ;;  %vm2735_vm9 = vcmask 916480   ;;  %s3286_s14 = scalar_lea.sflag [#allocation4], %s4714_s19 }
  0xeb   : > { %3657 = vmatprep.subr.bf16.mxu1 %v4343_v3  ;;  %v3951_v34 = vld [vmem:[#allocation8 + $0x10] sm:$0xff]   ;;  %v3954_v37 = vld [vmem:[#allocation8 + $0x28] sm:$0xff]   ;;  %v3956_v39 = vld [vmem:[#allocation8 + $0x38] sm:$0xff]   ;;  %p5237_p9 = scmp.ne.s32.totalorder %s5218_s3, 0 }
  0xec   : > { %v3955_v38 = vld [vmem:[#allocation8 + $0x30] sm:$0xff]  }
  0xed   : > { %3638 = vmatpush3.bf16.msra.mxu0 %v3937_v6  ;;  %v3457_v40 = vld [vmem:[%s5176_s6] ss:$0 sm:$0xff] }
  0xee   : > { %3639 = vmatprep.subr.bf16.mxu0 %v4343_v3  ;;  %3658 = vmatpush3.bf16.msra.mxu1 %v3938_v11  ;;  %v3448_v41 = vld [vmem:[%s5174_s4] ss:$0 sm:$0xff] }
  0xef   : > { %3659 = vmatprep.subr.bf16.mxu1 %v4343_v3  ;;  %v3466_v54 = vld [vmem:[%s5230_s20] ss:$0 sm:$0xff]  ;;  %s5234_s20 = sld [smem:[#allocation28_spill]] }
  0xf1   : > { %3640 = vmatpush3.bf16.msra.mxu0 %v3939_v12 }
  0xf2   : > { %3660 = vmatpush3.bf16.msra.mxu1 %v3940_v13  ;;  %3641 = vmatprep.subr.bf16.mxu0 %v4343_v3 }
  0xf3   : > { %3661 = vmatprep.subr.bf16.mxu1 %v4343_v3 }
  0xf5   : > { %3642 = vmatpush3.bf16.msra.mxu0 %v3941_v14 }
  0xf6   : > { %3662 = vmatpush3.bf16.msra.mxu1 %v3942_v15  ;;  %3643 = vmatprep.subr.bf16.mxu0 %v4343_v3 }
  0xf7   : > { %3663 = vmatprep.subr.bf16.mxu1 %v4343_v3 }
  0xf9   : > { %3644 = vmatpush3.bf16.msra.mxu0 %v3943_v16 }
  0xfa   : > { %3664 = vmatpush3.bf16.msra.mxu1 %v3944_v17  ;;  %3645 = vmatprep.subr.bf16.mxu0 %v4343_v3 }
  0xfb   : > { %3665 = vmatprep.subr.bf16.mxu1 %v4343_v3 }
  0xfd   : > { %3646 = vmatpush3.bf16.msra.mxu0 %v3945_v18 }
  0xfe   : > { %3666 = vmatpush3.bf16.msra.mxu1 %v3946_v19  ;;  %3647 = vmatprep.subr.bf16.mxu0 %v4343_v3 }
  0xff   : > { %3667 = vmatprep.subr.bf16.mxu1 %v4343_v3 }
 0x101   : > { %3648 = vmatpush3.bf16.msra.mxu0 %v3947_v20 }
 0x102   : > { %3668 = vmatpush3.bf16.msra.mxu1 %v3948_v21  ;;  %3673 = vmatprep.subr.bf16.mxu0 %v4343_v3 }
 0x103   : > { %3693 = vmatprep.subr.bf16.mxu1 %v4343_v3 }
 0x171   : > { %v656_v7 = vpop.xlane.xlu0 %655 }
 0x172   : > { %v658_v8 = vmul.f32 0.0078125, %v656_v7  ;;  %v4825_v7 = vshrl.u32 %v1042_v2, 7 }
 0x174   : > { %v659_v9 = vsub.f32 %v652_v0, %v658_v8  ;;  %v4352_v0 = vmov 1983009808   ;;  %v4353_v8 = vmov 1934713408  }
 0x175   : > { %v1040_v1 = vunpack.c.l.s4 %v4352_v0 }
 0x176   : > { %v660_v10 = vmul.f32 %v659_v9, %v659_v9 }
 0x177   : > { %v1041_v6 = vunpack.c.0.s8 %v1040_v1 }
 0x178   : > { %661 = vadd.xlane.f32.xlu0 %v660_v10 }
 0x179   : > { %v4828_v11 = vsub.s32 %v1041_v6, %v4825_v7 }
 0x205   : > { %v662_v22 = vpop.xlane.xlu0 %661 }
 0x206   : > { %v663_v23 = vmul.f32 0.0078125, %v662_v22 }
 0x208   : > { %v664_v24 = vadd.f32 1e-05, %v663_v23 }
 0x20a   : > { %4005 = vrsqrt.f32 %v664_v24 }
 0x214   : > { %v4006_v25 = vpop.eup %4005 }
 0x215   : > { %v666_v27 = vmul.f32 %v4006_v25, %v659_v9  ;;  %v1057_v9 = vunpack.c.l.s4 %v4353_v8 }
 0x217   : > { %v673_v29 = vmul.f32 %v3446_v26, %v666_v27  ;;  %v1058_v13 = vunpack.c.0.s8 %v1057_v9 }
 0x219   : > { %v680_v30 = vadd.f32 %v3447_v28, %v673_v29  ;;  %v4832_v18 = vsub.s32 %v1058_v13, %v4825_v7 }
 0x21b   : > { %v681_v32 = vpack.c.bf16 %v680_v30, %v680_v30 }
 0x21d   : > { %3650 = vmatmul.mubr.bf16.vlgmr.msra.gmra.mrb[0].mxu0 %v681_v32  ;;  %3670 = vmatmul.mubr.bf16.vlgmr.msra.gmra.mrb[0].mxu1 %v681_v32 }
 0x21e   : > { %3674 = vmatpush3.bf16.msra.mxu0 %v3949_v31  ;;  %3689 = vmatprep.mubr.msk.bf16.mxu0 %vm4344_vm0, %v4343_v3 }
 0x21f   : > { %3675 = vmatprep.subr.bf16.mxu0 %v4343_v3  ;;  %3695 = vmatprep.mubr.msk.bf16.mxu1 %vm4344_vm0, %v4343_v3 }
 0x222   : > { %3676 = vmatpush3.bf16.msra.mxu0 %v3950_v33 }
 0x223   : > { %3677 = vmatprep.subr.bf16.mxu0 %v4343_v3 }
 0x226   : > { %3678 = vmatpush3.bf16.msra.mxu0 %v3951_v34 }
 0x227   : > { %3679 = vmatprep.subr.bf16.mxu0 %v4343_v3 }
 0x22a   : > { %3680 = vmatpush3.bf16.msra.mxu0 %v3952_v35  ;;  %v4354_v35 = vmov 0  }
 0x22b   : > { %3681 = vmatprep.subr.bf16.mxu0 %v4343_v3 }
 0x22e   : > { %3682 = vmatpush3.bf16.msra.mxu0 %v3953_v36 }
 0x22f   : > { %3683 = vmatprep.subr.bf16.mxu0 %v4343_v3 }
 0x232   : > { %3684 = vmatpush3.bf16.msra.mxu0 %v3954_v37 }
 0x233   : > { %3685 = vmatprep.subr.bf16.mxu0 %v4343_v3 }
 0x236   : > { %3686 = vmatpush3.bf16.msra.mxu0 %v3955_v38 }
 0x237   : > { %3687 = vmatprep.subr.bf16.mxu0 %v4343_v3 }
 0x23a   : > { %3688 = vmatpush3.bf16.msra.mxu0 %v3956_v39 }
 0x23b   : > { %3741 = vmatprep.subr.bf16.mxu0 %v4343_v3 }
 0x23d   : > { %3690 = vmatmul.mubr.bf16.vlgmr.msra.gmra.mrb[4].mxu0 %v681_v32 }
 0x23e   : > { %3743 = vmatprep.mubr.msk.bf16.mxu0 %vm4344_vm0, %v4343_v3 }
 0x2f0   : > { %v787_v42 = vpop.f32.mrb[0].mxu0  ;;  %v898_v43 = vpop.f32.mrb[0].mxu1 }
 0x2f1   : > { %v899_v44 = vadd.f32 %v3457_v40, %v898_v43  ;;  %v3651_v45 = vpop.f32.mrb[1].mxu0  ;;  %v3671_v46 = vpop.f32.mrb[1].mxu1  ;;  %v788_v49 = vadd.f32 %v3448_v41, %v787_v42 }
 0x2f2   : > { %v790_v47 = vpop.f32.mrb[2].mxu0  ;;  %v901_v48 = vpop.f32.mrb[2].mxu1 }
 0x2f3   : > { %v1230_v50 = vpack.c.bf16 %v899_v44, %v899_v44  ;;  %v3652_v51 = vpop.f32.mrb[3].mxu0  ;;  %v3672_v52 = vpop.f32.mrb[3].mxu1  ;;  %v4789_v53 = vpack.c.bf16 %v788_v49, %v788_v49 }
 0x2f5   : > { %1238 = vrot.lane.b32.xlu0 %v1230_v50, %s4345_s10  ;;  %1232 = vrot.lane.b32.xlu1 %v1230_v50, %s4346_s7 }
 0x2f9   : > { %1235 = vrot.lane.b32.xlu1 %v1230_v50, %s4347_s30  ;;  %1023 = vrot.lane.b32.xlu0 %v4789_v53, %s4345_s10 }
 0x2fd   : > { %1241 = vrot.lane.b32.xlu1 %v1230_v50, %s4348_s17  ;;  %1029 = vrot.lane.b32.xlu0 %v4789_v53, %s4349_s28 }
 0x301   : > { %1244 = vrot.lane.b32.xlu1 %v1230_v50, %s4349_s28  ;;  %1035 = vrot.lane.b32.xlu0 %v4789_v53, %s4350_s16 }
 0x305   : > { %1247 = vrot.lane.b32.xlu1 %v1230_v50, %s4351_s1 }
 0x309   : > { %1250 = vrot.lane.b32.xlu1 %v1230_v50, %s4350_s16 }
 0x30d   : > { %1017 = vrot.lane.b32.xlu1 %v4789_v53, %s4346_s7 }
 0x310   : > { %v1009_v55 = vpop.f32.mrb[4].mxu0 }
 0x311   : > { %v1010_v56 = vadd.f32 %v3466_v54, %v1009_v55  ;;  %v3691_v57 = vpop.f32.mrb[5].mxu0  ;;  %1020 = vrot.lane.b32.xlu1 %v4789_v53, %s4347_s30 }
 0x312   : > { %v1012_v58 = vpop.f32.mrb[6].mxu0 }
 0x313   : > { %v4809_v59 = vpack.c.bf16 %v1010_v56, %v1010_v56  ;;  %v3692_v60 = vpop.f32.mrb[7].mxu0 }
 0x315   : > { %1447 = vrot.lane.b32.xlu0 %v4809_v59, %s4346_s7  ;;  %1026 = vrot.lane.b32.xlu1 %v4789_v53, %s4348_s17 }
 0x319   : > { %1456 = vrot.lane.b32.xlu0 %v4809_v59, %s4348_s17  ;;  %1032 = vrot.lane.b32.xlu1 %v4789_v53, %s4351_s1 }
 0x31d   : > { %1450 = vrot.lane.b32.xlu1 %v4809_v59, %s4347_s30 }
 0x321   : > { %1453 = vrot.lane.b32.xlu1 %v4809_v59, %s4345_s10 }
 0x325   : > { %1459 = vrot.lane.b32.xlu1 %v4809_v59, %s4349_s28 }
 0x367   : > { %v1233_v61 = vpop.permute.xlu1 %1232  ;;  %v1239_v62 = vpop.permute.xlu0 %1238 }
 0x36b   : > { %v1236_v63 = vpop.permute.xlu1 %1235  ;;  %v1024_v5 = vpop.permute.xlu0 %1023 }
 0x36f   : > { %v1242_v4 = vpop.permute.xlu1 %1241  ;;  %v1030_v14 = vpop.permute.xlu0 %1029 }
 0x370   : > { %v1253_v12 = vcombine.low %v1230_v50, %v1242_v4 }
 0x372   : > { %v1260_v17 = vrot.slane %v1253_v12, %v4828_v11 }
 0x373   : > { %v1245_v10 = vpop.permute.xlu1 %1244  ;;  %v1036_v25 = vpop.permute.xlu0 %1035 }
 0x374   : > { %v1287_v20 = vcombine.low %v1233_v61, %v1245_v10  ;;  %v1080_v30 = vcombine.low %v1024_v5, %v1036_v25 }
 0x376   : > { %v1294_v28 = vrot.slane %v1287_v20, %v4828_v11  ;;  %v1087_v41 = vrot.slane %v1080_v30, %v4828_v11 }
 0x377   : > { %v1248_v15 = vpop.permute.xlu1 %1247 }
 0x378   : > { %v1261_v16 = vcombine.low %v1236_v63, %v1248_v15 }
 0x37a   : > { %v1268_v19 = vrot.slane %v1261_v16, %v4828_v11 }
 0x37b   : > { %v1251_v21 = vpop.permute.xlu1 %1250 }
 0x37c   : > { %v1269_v22 = vcombine.low %v1260_v17, %v1268_v19  ;;  %v1270_v23 = vcombine.high %v1260_v17, %v1268_v19  ;;  %v1295_v24 = vcombine.low %v1239_v62, %v1251_v21 }
 0x37e   : > { %v1277_v26 = vrot.slane %v1269_v22, %v4832_v18  ;;  %v1302_v27 = vrot.slane %v1295_v24, %v4828_v11  ;;  %v1284_v31 = vrot.slane %v1270_v23, %v4832_v18 }
 0x37f   : > { %v1018_v29 = vpop.permute.xlu1 %1017 }
 0x380   : > { %v1303_v32 = vcombine.low %v1294_v28, %v1302_v27  ;;  %v1304_v33 = vcombine.high %v1294_v28, %v1302_v27  ;;  %v1072_v34 = vcombine.low %v1018_v29, %v1030_v14  ;;  %v1285_v36 = vcombine.high %v1277_v26, %v4354_v35 }
 0x381   : > { %v1286_v42 = vcombine.high %v1284_v31, %v4354_v35  ;;  %v1325_v43 = vshrl.u32 %v1277_v26, 16  ;;  %v1341_v44 = vshrl.u32 %v1284_v31, 16 }
 0x382   : > { %v1311_v37 = vrot.slane %v1303_v32, %v4832_v18  ;;  %v1318_v38 = vrot.slane %v1304_v33, %v4832_v18  ;;  %v1079_v39 = vrot.slane %v1072_v34, %v4828_v11  ;;  %v1333_v49 = vshrl.u32 %v1285_v36, 16 }
 0x383   : > { %v1021_v40 = vpop.permute.xlu1 %1020  ;;  %v1349_v60 = vshrl.u32 %v1286_v42, 16 }
 0x384   : > { %v1319_v45 = vcombine.high %v1311_v37, %v4354_v35  ;;  %v1320_v46 = vcombine.high %v1318_v38, %v4354_v35  ;;  %v1323_v47 = vpack.i.b16 %v1311_v37, %v1277_v26  ;;  %v1326_v48 = vshrl.u32 %v1311_v37, 16 }
 0x385   : > { %v1339_v50 = vpack.i.b16 %v1318_v38, %v1284_v31  ;;  %v1342_v51 = vshrl.u32 %v1318_v38, 16  ;;  %v1088_v52 = vcombine.low %v1079_v39, %v1087_v41  ;;  %v1089_v2 = vcombine.high %v1079_v39, %v1087_v41 }
 0x386   : > { %v1327_v54 = vpack.i.b16 %v1326_v48, %v1325_v43  ;;  %v1331_v55 = vpack.i.b16 %v1319_v45, %v1285_v36  ;;  %v1334_v56 = vshrl.u32 %v1319_v45, 16  ;;  %v1347_v57 = vpack.i.b16 %v1320_v46, %v1286_v42 }
 0x387   : > { %v1027_v58 = vpop.permute.xlu1 %1026  ;;  %v1343_v61 = vpack.i.b16 %v1342_v51, %v1341_v44  ;;  %v1350_v62 = vshrl.u32 %v1320_v46, 16  ;;  %v1353_v0 = vcombine.low %v1323_v47, %v1339_v50  ;;  %v1096_v8 = vrot.slane %v1088_v52, %v4832_v18 }
 0x388   : > { %v1335_v63 = vpack.i.b16 %v1334_v56, %v1333_v49  ;;  %v1361_v1 = vcombine.low %v1331_v55, %v1347_v57  ;;  %v1038_v5 = vcombine.low %v4789_v53, %v1027_v58  ;;  %v1103_v13 = vrot.slane %v1089_v2, %v4832_v18 }
 0x389   : > { %v1351_v4 = vpack.i.b16 %v1350_v62, %v1349_v60  ;;  %v1387_v6 = vcombine.low %v1327_v54, %v1343_v61  ;;  %v4854_v14 = vrot.slane %v1353_v0, %v4828_v11  ;;  %v1104_v53 = vcombine.high %v1096_v8, %v4354_v35 }
 0x38a   : > { %v4850_v12 = vrot.slane %v1361_v1, %v4828_v11  ;;  %v1045_v16 = vrot.slane %v1038_v5, %v4828_v11  ;;  %v1105_v24 = vcombine.high %v1103_v13, %v4354_v35  ;;  %v1111_v26 = vshrl.u32 %v1096_v8, 16 }
 0x38b   : > { %v1033_v9 = vpop.permute.xlu1 %1032  ;;  %v1395_v15 = vcombine.low %v1335_v63, %v1351_v4  ;;  %v4862_v20 = vrot.slane %v1387_v6, %v4828_v11  ;;  %v1119_v29 = vshrl.u32 %v1104_v53, 16  ;;  %v1127_v30 = vshrl.u32 %v1103_v13, 16 }
 0x38c   : > { %v1046_v10 = vcombine.low %v1021_v40, %v1033_v9  ;;  %v1369_v19 = vcombine.low %v4854_v14, %v4850_v12  ;;  %v1135_v38 = vshrl.u32 %v1105_v24, 16 }
 0x38d   : > { %v4865_v21 = vrot.slane %v1395_v15, %v4828_v11 }
 0x38e   : > { %v1053_v17 = vrot.slane %v1046_v10, %v4828_v11  ;;  %v1377_v31 = vrot.slane %v1369_v19, %v4832_v18 }
 0x38f   : > { %v1403_v25 = vcombine.low %v4862_v20, %v4865_v21 }
 0x390   : > { %v1054_v22 = vcombine.low %v1045_v16, %v1053_v17  ;;  %v1055_v23 = vcombine.high %v1045_v16, %v1053_v17  ;;  %v1424_v0 = vshrl.u32 %v1377_v31, 16  ;;  %v1385_v10 = vcombine.high %v1377_v31, %v4354_v35 }
 0x391   : > { %v1411_v32 = vrot.slane %v1403_v25, %v4832_v18  ;;  %v1404_v25 = vcombine.high %v4862_v20, %v4865_v21 }
 0x392   : > { %v1062_v27 = vrot.slane %v1054_v22, %v4832_v18  ;;  %v1069_v28 = vrot.slane %v1055_v23, %v4832_v18  ;;  %v1430_v22 = vshrl.u32 %v1385_v10, 16 }
 0x393   : > { %v1423_v41 = vpack.i.b16 %v1411_v32, %v1377_v31  ;;  %v1425_v62 = vshrl.u32 %v1411_v32, 16 }
 0x394   : > { %v1070_v33 = vcombine.high %v1062_v27, %v4354_v35  ;;  %v1071_v34 = vcombine.high %v1069_v28, %v4354_v35  ;;  %v1108_v36 = vpack.i.b16 %v1096_v8, %v1062_v27  ;;  %v1110_v37 = vshrl.u32 %v1062_v27, 16 }
 0x395   : > { %v1124_v39 = vpack.i.b16 %v1103_v13, %v1069_v28  ;;  %v1126_v40 = vshrl.u32 %v1069_v28, 16  ;;  %v1665_v49 = vsel %vm1660_vm1, %v1423_v41, 0  ;;  %v1426_v4 = vpack.i.b16 %v1425_v62, %v1424_v0 }
 0x396   : > { %v1112_v42 = vpack.i.b16 %v1111_v26, %v1110_v37  ;;  %v1116_v43 = vpack.i.b16 %v1104_v53, %v1070_v33  ;;  %v1118_v44 = vshrl.u32 %v1070_v33, 16  ;;  %v1132_v45 = vpack.i.b16 %v1105_v24, %v1071_v34  ;;  %3694 = vmatpush3.bf16.xpose.msra.mxu1 %v1665_v49 }
 0x397   : > { %v1128_v46 = vpack.i.b16 %v1127_v30, %v1126_v40  ;;  %v1134_v47 = vshrl.u32 %v1071_v34, 16  ;;  %v1138_v48 = vcombine.low %v1108_v36, %v1124_v39  ;;  %3699 = vmatprep.subr.bf16.mxu1 %v4343_v3  ;;  %v1711_v6 = vsel %vm1660_vm1, %v1426_v4, 0 }
 0x398   : > { %v1120_v50 = vpack.i.b16 %v1119_v29, %v1118_v44  ;;  %v1146_v51 = vcombine.low %v1116_v43, %v1132_v45  ;;  %v1419_v8 = vcombine.high %v1411_v32, %v4354_v35  ;;  %v1370_v27 = vcombine.high %v4854_v14, %v4850_v12 }
 0x399   : > { %v1136_v52 = vpack.i.b16 %v1135_v38, %v1134_v47  ;;  %v1172_v54 = vcombine.low %v1112_v42, %v1128_v46  ;;  %v1145_v56 = vrot.slane %v1138_v48, %v4828_v11  ;;  %v1418_v29 = vrot.slane %v1404_v25, %v4832_v18 }
 0x39a   : > { %v1153_v55 = vrot.slane %v1146_v51, %v4828_v11  ;;  %v1429_v15 = vpack.i.b16 %v1419_v8, %v1385_v10  ;;  %v1431_v53 = vshrl.u32 %v1419_v8, 16  ;;  %v1384_v31 = vrot.slane %v1370_v27, %v4832_v18 }
 0x39b   : > { %v1180_v57 = vcombine.low %v1120_v50, %v1136_v52  ;;  %v1179_v60 = vrot.slane %v1172_v54, %v4828_v11  ;;  %v1437_v34 = vshrl.u32 %v1418_v29, 16  ;;  %v1420_v42 = vcombine.high %v1418_v29, %v4354_v35 }
 0x39c   : > { %v1154_v58 = vcombine.low %v1145_v56, %v1153_v55  ;;  %v1757_v17 = vsel %vm1660_vm1, %v1429_v15, 0  ;;  %v1432_v24 = vpack.i.b16 %v1431_v53, %v1430_v22  ;;  %v1435_v21 = vpack.i.b16 %v1418_v29, %v1384_v31 }
 0x39d   : > { %v1187_v61 = vrot.slane %v1180_v57, %v4828_v11  ;;  %v1155_v12 = vcombine.high %v1145_v56, %v1153_v55  ;;  %v1436_v37 = vshrl.u32 %v1384_v31, 16  ;;  %v1386_v44 = vcombine.high %v1384_v31, %v4354_v35 }
 0x39e   : > { %v1162_v1 = vrot.slane %v1154_v58, %v4832_v18  ;;  %v1803_v28 = vsel %vm1660_vm1, %v1432_v24, 0  ;;  %v1849_v14 = vsel %vm1660_vm1, %v1435_v21, 0  ;;  %v1443_v49 = vshrl.u32 %v1420_v42, 16 }
 0x39f   : > { %v1188_v63 = vcombine.low %v1179_v60, %v1187_v61  ;;  %v1189_v33 = vcombine.high %v1179_v60, %v1187_v61  ;;  %v1169_v38 = vrot.slane %v1155_v12, %v4832_v18  ;;  %v1438_v39 = vpack.i.b16 %v1437_v34, %v1436_v37 }
 0x3a0   : > { %v1209_v13 = vshrl.u32 %v1162_v1, 16  ;;  %v1170_v23 = vcombine.high %v1162_v1, %v4354_v35  ;;  %v1441_v46 = vpack.i.b16 %v1420_v42, %v1386_v44  ;;  %v1442_v51 = vshrl.u32 %v1386_v44, 16 }
 0x3a1   : > { %v1196_v2 = vrot.slane %v1188_v63, %v4832_v18  ;;  %v1203_v36 = vrot.slane %v1189_v33, %v4832_v18  ;;  %v1895_v41 = vsel %vm1660_vm1, %v1438_v39, 0  ;;  %v1221_v45 = vshrl.u32 %v1169_v38, 16 }
 0x3a2   : > { %v1215_v20 = vshrl.u32 %v1170_v23, 16  ;;  %v1941_v48 = vsel %vm1660_vm1, %v1441_v46, 0  ;;  %v1171_v52 = vcombine.high %v1169_v38, %v4354_v35  ;;  %v1444_v54 = vpack.i.b16 %v1443_v49, %v1442_v51  ;;  %v1451_v49 = vpop.permute.xlu1 %1450 }
 0x3a3   : > { %v1208_v5 = vpack.i.b16 %v1196_v2, %v1162_v1  ;;  %v1210_v9 = vshrl.u32 %v1196_v2, 16  ;;  %v1204_v19 = vcombine.high %v1196_v2, %v4354_v35  ;;  %v1220_v40 = vpack.i.b16 %v1203_v36, %v1169_v38 }
 0x3a4   : > { %v1222_v43 = vshrl.u32 %v1203_v36, 16  ;;  %v1205_v50 = vcombine.high %v1203_v36, %v4354_v35  ;;  %v1987_v56 = vsel %vm1660_vm1, %v1444_v54, 0  ;;  %v1227_v58 = vshrl.u32 %v1171_v52, 16 }
 0x3a5   : > { %3696 = vmatmul.mubr.msk.bf16.vlgmr.msra.gmra.mrb[4].mxu1 %vm1660_vm1, %v1208_v5  ;;  %v1211_v16 = vpack.i.b16 %v1210_v9, %v1209_v13  ;;  %v1214_v26 = vpack.i.b16 %v1204_v19, %v1170_v23  ;;  %v1216_v30 = vshrl.u32 %v1204_v19, 16 }
 0x3a6   : > { %3700 = vmatpush3.bf16.xpose.msra.mxu1 %v1711_v6  ;;  %3701 = vmatprep.mubr.msk.bf16.mxu1 %vm4344_vm0, %v4343_v3  ;;  %v1223_v47 = vpack.i.b16 %v1222_v43, %v1221_v45  ;;  %v1226_v55 = vpack.i.b16 %v1205_v50, %v1171_v52  ;;  %v1228_v57 = vshrl.u32 %v1205_v50, 16  ;;  %v1454_v50 = vpop.permute.xlu1 %1453  ;;  %v1448_v52 = vpop.permute.xlu0 %1447 }
 0x3a7   : > { %3705 = vmatprep.subr.bf16.mxu1 %v4343_v3  ;;  %v1217_v32 = vpack.i.b16 %v1216_v30, %v1215_v20 }
 0x3a8   : > { %v1229_v60 = vpack.i.b16 %v1228_v57, %v1227_v58 }
 0x3aa   : > { %v1460_v51 = vpop.permute.xlu1 %1459  ;;  %v1457_v57 = vpop.permute.xlu0 %1456 }
 0x3ad   : > { %3702 = vmatmul.mubr.msk.bf16.vlgmr.msra.gmra.mrb[8].mxu1 %vm1660_vm1, %v1211_v16 }
 0x3ae   : > { %3706 = vmatpush3.bf16.xpose.msra.mxu1 %v1757_v17  ;;  %3707 = vmatprep.mubr.msk.bf16.mxu1 %vm4344_vm0, %v4343_v3 }
 0x3af   : > { %3711 = vmatprep.subr.bf16.mxu1 %v4343_v3 }
 0x3b5   : > { %3708 = vmatmul.mubr.msk.bf16.vlgmr.msra.gmra.mrb[12].mxu1 %vm1660_vm1, %v1214_v26 }
 0x3b6   : > { %3712 = vmatpush3.bf16.xpose.msra.mxu1 %v1803_v28  ;;  %3713 = vmatprep.mubr.msk.bf16.mxu1 %vm4344_vm0, %v4343_v3 }
 0x3b7   : > { %3717 = vmatprep.subr.bf16.mxu1 %v4343_v3 }
 0x3bd   : > { %3714 = vmatmul.mubr.msk.bf16.vlgmr.msra.gmra.mrb[16].mxu1 %vm1660_vm1, %v1217_v32 }
 0x3be   : > { %3718 = vmatpush3.bf16.xpose.msra.mxu1 %v1849_v14  ;;  %3719 = vmatprep.mubr.msk.bf16.mxu1 %vm4344_vm0, %v4343_v3 }
 0x3bf   : > { %3723 = vmatprep.subr.bf16.mxu1 %v4343_v3 }
 0x3c5   : > { %3720 = vmatmul.mubr.msk.bf16.vlgmr.msra.gmra.mrb[20].mxu1 %vm1660_vm1, %v1220_v40 }
 0x3c6   : > { %3724 = vmatpush3.bf16.xpose.msra.mxu1 %v1895_v41  ;;  %3725 = vmatprep.mubr.msk.bf16.mxu1 %vm4344_vm0, %v4343_v3 }
 0x3c7   : > { %3729 = vmatprep.subr.bf16.mxu1 %v4343_v3 }
 0x3cd   : > { %3726 = vmatmul.mubr.msk.bf16.vlgmr.msra.gmra.mrb[24].mxu1 %vm1660_vm1, %v1223_v47 }
 0x3ce   : > { %3730 = vmatpush3.bf16.xpose.msra.mxu1 %v1941_v48  ;;  %3731 = vmatprep.mubr.msk.bf16.mxu1 %vm4344_vm0, %v4343_v3 }
 0x3cf   : > { %3735 = vmatprep.subr.bf16.mxu1 %v4343_v3 }
 0x3d5   : > { %3732 = vmatmul.mubr.msk.bf16.vlgmr.msra.gmra.mrb[28].mxu1 %vm1660_vm1, %v1226_v55 }
 0x3d6   : > { %3736 = vmatpush3.bf16.xpose.msra.mxu1 %v1987_v56  ;;  %3737 = vmatprep.mubr.msk.bf16.mxu1 %vm4344_vm0, %v4343_v3 }
 0x3d7   : > { %3747 = vmatprep.subr.bf16.mxu1 %v4343_v3 }
 0x3dd   : > { %3738 = vmatmul.mubr.msk.bf16.vlgmr.msra.gmra.mrb[32].mxu1 %vm1660_vm1, %v1229_v60  ;;  %v1502_v60 = vcombine.low %v1448_v52, %v1460_v51 }
 0x3de   : > { %3749 = vmatprep.mubr.msk.bf16.mxu1 %vm4344_vm0, %v4343_v3 }
 0x478   : > { %v1701_v61 = vpop.f32.mrb[4].mxu1 }
 0x479   : > { %v4938_v62 = vmul.f32 0.088388346, %v1701_v61  ;;  %v3697_v63 = vpop.f32.mrb[5].mxu1 }
 0x47a   : > { %v1704_v0 = vpop.f32.mrb[6].mxu1 }
 0x47b   : > { %v3698_v1 = vpop.f32.mrb[7].mxu1  ;;  %v2038_v2 = vsel %vm2037_vm2, %v4938_v62, -inf }
 0x47c   : > { %2039 = vmax.xlane.f32.xlu1 %v2038_v2  ;;  %v1509_v1 = vrot.slane %v1502_v60, %v4828_v11 }
 0x480   : > { %v1747_v4 = vpop.f32.mrb[8].mxu1 }
 0x481   : > { %v4942_v5 = vmul.f32 0.088388346, %v1747_v4  ;;  %v3703_v6 = vpop.f32.mrb[9].mxu1 }
 0x482   : > { %v1750_v8 = vpop.f32.mrb[10].mxu1 }
 0x483   : > { %v3704_v9 = vpop.f32.mrb[11].mxu1  ;;  %v2041_v10 = vsel %vm2037_vm2, %v4942_v5, -inf }
 0x484   : > { %2042 = vmax.xlane.f32.xlu0 %v2041_v10  ;;  %v1468_v9 = vcombine.low %v4809_v59, %v1457_v57 }
 0x488   : > { %v1793_v13 = vpop.f32.mrb[12].mxu1 }
 0x489   : > { %v3709_v15 = vpop.f32.mrb[13].mxu1  ;;  %v4956_v40 = vmul.f32 0.088388346, %v1793_v13 }
 0x48a   : > { %v1796_v16 = vpop.f32.mrb[14].mxu1 }
 0x48b   : > { %v3710_v17 = vpop.f32.mrb[15].mxu1  ;;  %v2044_v43 = vsel %vm2037_vm2, %v4956_v40, -inf }
 0x48c   : > { %v1475_v17 = vrot.slane %v1468_v9, %v4828_v11 }
 0x48d   : > { %1465 = vrot.lane.b32.xlu1 %v4809_v59, %s4350_s16 }
 0x490   : > { %v1839_v53 = vpop.f32.mrb[16].mxu1 }
 0x491   : > { %v3715_v19 = vpop.f32.mrb[17].mxu1  ;;  %v4950_v12 = vmul.f32 0.088388346, %v1839_v53 }
 0x492   : > { %v1842_v22 = vpop.f32.mrb[18].mxu1 }
 0x493   : > { %v3716_v23 = vpop.f32.mrb[19].mxu1  ;;  %v2047_v36 = vsel %vm2037_vm2, %v4950_v12, -inf }
 0x498   : > { %v1885_v24 = vpop.f32.mrb[20].mxu1 }
 0x499   : > { %v3721_v25 = vpop.f32.mrb[21].mxu1  ;;  %v4960_v42 = vmul.f32 0.088388346, %v1885_v24 }
 0x49a   : > { %v1888_v26 = vpop.f32.mrb[22].mxu1  ;;  %1462 = vrot.lane.b32.xlu0 %v4809_v59, %s4351_s1 }
 0x49b   : > { %v3722_v27 = vpop.f32.mrb[23].mxu1  ;;  %v2050_v45 = vsel %vm2037_vm2, %v4960_v42, -inf }
 0x4a0   : > { %v1931_v28 = vpop.f32.mrb[24].mxu1 }
 0x4a1   : > { %v3727_v29 = vpop.f32.mrb[25].mxu1  ;;  %v4964_v44 = vmul.f32 0.088388346, %v1931_v28 }
 0x4a2   : > { %v1934_v30 = vpop.f32.mrb[26].mxu1 }
 0x4a3   : > { %v3728_v31 = vpop.f32.mrb[27].mxu1  ;;  %v2053_v47 = vsel %vm2037_vm2, %v4964_v44, -inf }
 0x4a8   : > { %v1977_v20 = vpop.f32.mrb[28].mxu1 }
 0x4a9   : > { %v3733_v21 = vpop.f32.mrb[29].mxu1  ;;  %v4952_v14 = vmul.f32 0.088388346, %v1977_v20 }
 0x4aa   : > { %v1980_v32 = vpop.f32.mrb[30].mxu1 }
 0x4ab   : > { %v3734_v33 = vpop.f32.mrb[31].mxu1  ;;  %v2056_v41 = vsel %vm2037_vm2, %v4952_v14, -inf }
 0x4b0   : > { %v2023_v34 = vpop.f32.mrb[32].mxu1 }
 0x4b1   : > { %v3739_v37 = vpop.f32.mrb[33].mxu1  ;;  %2048 = vmax.xlane.f32.xlu1 %v2047_v36  ;;  %v4968_v46 = vmul.f32 0.088388346, %v2023_v34 }
 0x4b2   : > { %v2026_v38 = vpop.f32.mrb[34].mxu1 }
 0x4b3   : > { %v3740_v39 = vpop.f32.mrb[35].mxu1  ;;  %v2059_v48 = vsel %vm2037_vm2, %v4968_v46, -inf }
 0x4b5   : > { %2057 = vmax.xlane.f32.xlu1 %v2056_v41 }
 0x4b9   : > { %2045 = vmax.xlane.f32.xlu0 %v2044_v43 }
 0x4bd   : > { %2051 = vmax.xlane.f32.xlu0 %v2050_v45 }
 0x4c1   : > { %2054 = vmax.xlane.f32.xlu0 %v2053_v47 }
 0x4c5   : > { %2060 = vmax.xlane.f32.xlu0 %v2059_v48 }
 0x509   : > { %v2040_v54 = vpop.xlane.xlu1 %2039 }
 0x50a   : > { %v2062_v55 = vsub.f32 %v4938_v62, %v2040_v54 }
 0x50c   : > { %v2070_v56 = vmul.f32 1.442695, %v2062_v55 }
 0x50d   : > { %v1466_v58 = vpop.permute.xlu1 %1465 }
 0x50e   : > { %4007 = vpow2.f32 %v2070_v56  ;;  %v1510_v61 = vcombine.low %v1454_v50, %v1466_v58 }
 0x510   : > { %v1517_v63 = vrot.slane %v1510_v61, %v4828_v11 }
 0x511   : > { %v2043_v0 = vpop.xlane.xlu0 %2042 }
 0x512   : > { %v2063_v2 = vsub.f32 %v4942_v5, %v2043_v0  ;;  %v1518_v4 = vcombine.low %v1509_v1, %v1517_v63  ;;  %v1519_v6 = vcombine.high %v1509_v1, %v1517_v63 }
 0x514   : > { %v2072_v8 = vmul.f32 1.442695, %v2063_v2  ;;  %v1526_v15 = vrot.slane %v1518_v4, %v4832_v18  ;;  %v1533_v16 = vrot.slane %v1519_v6, %v4832_v18 }
 0x515   : > { %v1463_v10 = vpop.permute.xlu0 %1462 }
 0x516   : > { %4009 = vpow2.f32 %v2072_v8  ;;  %v1476_v62 = vcombine.low %v1451_v49, %v1463_v10  ;;  %v1534_v59 = vcombine.high %v1526_v15, %v4354_v35  ;;  %v1535_v23 = vcombine.high %v1533_v16, %v4354_v35 }
 0x517   : > { %v1541_v26 = vshrl.u32 %v1526_v15, 16  ;;  %v1557_v27 = vshrl.u32 %v1533_v16, 16 }
 0x518   : > { %v4979_v13 = vpop.eup %4007  ;;  %v1483_v53 = vrot.slane %v1476_v62, %v4828_v11  ;;  %v1549_v20 = vshrl.u32 %v1534_v59, 16  ;;  %v1565_v21 = vshrl.u32 %v1535_v23, 16 }
 0x519   : > { %v2086_v5 = vsel %vm2037_vm2, %v4979_v13, 0.0 }
 0x51a   : > { %2087 = vadd.xlane.f32.xlu1 %v2086_v5  ;;  %v1484_v19 = vcombine.low %v1475_v17, %v1483_v53  ;;  %v1485_v22 = vcombine.high %v1475_v17, %v1483_v53  ;;  %v2110_v17 = vpack.c.bf16 %v4979_v13, %v4979_v13 }
 0x51c   : > { %v1492_v24 = vrot.slane %v1484_v19, %v4832_v18  ;;  %v1499_v25 = vrot.slane %v1485_v22, %v4832_v18 }
 0x51e   : > { %v1500_v28 = vcombine.high %v1492_v24, %v4354_v35  ;;  %v1501_v29 = vcombine.high %v1499_v25, %v4354_v35  ;;  %v1538_v30 = vpack.i.b16 %v1526_v15, %v1492_v24  ;;  %v1540_v31 = vshrl.u32 %v1492_v24, 16 }
 0x51f   : > { %v1554_v32 = vpack.i.b16 %v1533_v16, %v1499_v25  ;;  %v1556_v33 = vshrl.u32 %v1499_v25, 16 }
 0x520   : > { %v4010_v34 = vpop.eup %4009  ;;  %v1542_v36 = vpack.i.b16 %v1541_v26, %v1540_v31  ;;  %v1546_v37 = vpack.i.b16 %v1534_v59, %v1500_v28  ;;  %v1548_v38 = vshrl.u32 %v1500_v28, 16  ;;  %v1562_v39 = vpack.i.b16 %v1535_v23, %v1501_v29 }
 0x521   : > { %v1558_v41 = vpack.i.b16 %v1557_v27, %v1556_v33  ;;  %v1564_v43 = vshrl.u32 %v1501_v29, 16  ;;  %v1568_v45 = vcombine.low %v1538_v30, %v1554_v32  ;;  %v2089_v47 = vsel %vm2037_vm2, %v4010_v34, 0.0 }
 0x522   : > { %v1550_v48 = vpack.i.b16 %v1549_v20, %v1548_v38  ;;  %v1576_v49 = vcombine.low %v1546_v37, %v1562_v39  ;;  %2090 = vadd.xlane.f32.xlu0 %v2089_v47  ;;  %v2111_v19 = vpack.c.bf16 %v4010_v34, %v4010_v34 }
 0x523   : > { %v1566_v50 = vpack.i.b16 %v1565_v21, %v1564_v43  ;;  %v1602_v51 = vcombine.low %v1542_v36, %v1558_v41  ;;  %v1575_v52 = vrot.slane %v1568_v45, %v4828_v11 }
 0x524   : > { %v1583_v54 = vrot.slane %v1576_v49, %v4828_v11 }
 0x525   : > { %v1610_v55 = vcombine.low %v1550_v48, %v1566_v50  ;;  %v1609_v57 = vrot.slane %v1602_v51, %v4828_v11 }
 0x526   : > { %v1584_v56 = vcombine.low %v1575_v52, %v1583_v54  ;;  %v1585_v25 = vcombine.high %v1575_v52, %v1583_v54 }
 0x527   : > { %v1617_v58 = vrot.slane %v1610_v55, %v4828_v11 }
 0x528   : > { %v1592_v60 = vrot.slane %v1584_v56, %v4832_v18  ;;  %v1599_v29 = vrot.slane %v1585_v25, %v4832_v18 }
 0x529   : > { %v1618_v61 = vcombine.low %v1609_v57, %v1617_v58  ;;  %v1619_v23 = vcombine.high %v1609_v57, %v1617_v58 }
 0x52a   : > { %v1600_v63 = vcombine.high %v1592_v60, %v4354_v35  ;;  %v1639_v2 = vshrl.u32 %v1592_v60, 16  ;;  %v1651_v33 = vshrl.u32 %v1599_v29, 16  ;;  %v1601_v54 = vcombine.high %v1599_v29, %v4354_v35 }
 0x52b   : > { %v1626_v0 = vrot.slane %v1618_v61, %v4832_v18  ;;  %v1633_v26 = vrot.slane %v1619_v23, %v4832_v18 }
 0x52c   : > { %v1645_v8 = vshrl.u32 %v1600_v63, 16  ;;  %v1657_v58 = vshrl.u32 %v1601_v54, 16 }
 0x52d   : > { %v1638_v1 = vpack.i.b16 %v1626_v0, %v1592_v60  ;;  %v1640_v4 = vshrl.u32 %v1626_v0, 16  ;;  %v1634_v6 = vcombine.high %v1626_v0, %v4354_v35  ;;  %v1652_v31 = vshrl.u32 %v1633_v26, 16 }
 0x52e   : > { %v1650_v48 = vpack.i.b16 %v1633_v26, %v1599_v29 }
 0x52f   : > { %v2123_v9 = vsel %vm2121_vm3, %v1638_v1, 0  ;;  %v1641_v10 = vpack.i.b16 %v1640_v4, %v1639_v2  ;;  %v1644_v62 = vpack.i.b16 %v1634_v6, %v1600_v63  ;;  %v1646_v15 = vshrl.u32 %v1634_v6, 16 }
 0x530   : > { %3742 = vmatpush3.bf16.msra.mxu0 %v2123_v9  ;;  %v1653_v34 = vpack.i.b16 %v1652_v31, %v1651_v33  ;;  %v2307_v55 = vsel %vm2121_vm3, %v1650_v48, 0 }
 0x531   : > { %v2169_v16 = vsel %vm2121_vm3, %v1641_v10, 0  ;;  %3753 = vmatprep.subr.bf16.mxu0 %v4343_v3  ;;  %v1647_v53 = vpack.i.b16 %v1646_v15, %v1645_v8  ;;  %v2215_v5 = vsel %vm2121_vm3, %v1644_v62, 0 }
 0x532   : > { %3748 = vmatpush3.bf16.msra.mxu1 %v2169_v16 }
 0x533   : > { %3744 = vmatmul.mubr.msk.bf16.vlgmr.msra.gmra.mrb[8].mxu0 %vm2037_vm2, %v2110_v17  ;;  %3759 = vmatprep.subr.bf16.mxu1 %v4343_v3  ;;  %v2261_v22 = vsel %vm2121_vm3, %v1647_v53, 0  ;;  %v3957_v17 = vld [vmem:[#allocation10] sm:$0xff]   ;;  %v3958_v53 = vld [vmem:[#allocation10 + $0x8] sm:$0xff]  }
 0x534   : > { %3754 = vmatpush3.bf16.msra.mxu0 %v2215_v5  ;;  %3755 = vmatprep.mubr.msk.bf16.mxu0 %vm4344_vm0, %v4343_v3  ;;  %v3959_v5 = vld [vmem:[#allocation10 + $0x10] sm:$0xff]  }
 0x535   : > { %3750 = vmatmul.mubr.msk.bf16.vlgmr.msra.gmra.mrb[36].mxu1 %vm2037_vm2, %v2111_v19  ;;  %3765 = vmatprep.subr.bf16.mxu0 %v4343_v3  ;;  %v3960_v19 = vld [vmem:[#allocation10 + $0x18] sm:$0xff]  }
 0x536   : > { %3760 = vmatpush3.bf16.msra.mxu1 %v2261_v22  ;;  %3761 = vmatprep.mubr.msk.bf16.mxu1 %vm4344_vm0, %v4343_v3  ;;  %v3961_v22 = vld [vmem:[#allocation10 + $0x20] sm:$0xff]  }
 0x537   : > { %3771 = vmatprep.subr.bf16.mxu1 %v4343_v3 }
 0x53e   : > { %v2049_v13 = vpop.xlane.xlu1 %2048 }
 0x53f   : > { %v2065_v59 = vsub.f32 %v4950_v12, %v2049_v13 }
 0x541   : > { %v2076_v24 = vmul.f32 1.442695, %v2065_v59 }
 0x542   : > { %v2058_v27 = vpop.xlane.xlu1 %2057 }
 0x543   : > { %4011 = vpow2.f32 %v2076_v24  ;;  %v2068_v20 = vsub.f32 %v4952_v14, %v2058_v27  ;;  %v2353_v14 = vsel %vm2121_vm3, %v1653_v34, 0 }
 0x545   : > { %v2082_v37 = vmul.f32 1.442695, %v2068_v20 }
 0x546   : > { %v2046_v28 = vpop.xlane.xlu0 %2045 }
 0x547   : > { %v2064_v30 = vsub.f32 %v4956_v40, %v2046_v28 }
 0x549   : > { %v2074_v21 = vmul.f32 1.442695, %v2064_v30 }
 0x54a   : > { %v2052_v32 = vpop.xlane.xlu0 %2051 }
 0x54b   : > { %4013 = vpow2.f32 %v2074_v21  ;;  %v2066_v12 = vsub.f32 %v4960_v42, %v2052_v32 }
 0x54d   : > { %v4012_v36 = vpop.eup %4011  ;;  %v2078_v38 = vmul.f32 1.442695, %v2066_v12 }
 0x54e   : > { %v2055_v39 = vpop.xlane.xlu0 %2054  ;;  %v2095_v41 = vsel %vm2037_vm2, %v4012_v36, 0.0  ;;  %v2113_v43 = vpack.c.bf16 %v4012_v36, %v4012_v36 }
 0x54f   : > { %4015 = vpow2.f32 %v2078_v38  ;;  %v2067_v40 = vsub.f32 %v4964_v44, %v2055_v39  ;;  %2096 = vadd.xlane.f32.xlu0 %v2095_v41  ;;  %v1635_v44 = vcombine.high %v1633_v26, %v4354_v35 }
 0x550   : > { %3762 = vmatmul.mubr.msk.bf16.vlgmr.msra.gmra.mrb[40].mxu1 %vm2037_vm2, %v2113_v43  ;;  %4017 = vpow2.f32 %v2082_v37 }
 0x551   : > { %v2080_v45 = vmul.f32 1.442695, %v2067_v40  ;;  %3772 = vmatpush3.bf16.msra.mxu1 %v2353_v14  ;;  %3773 = vmatprep.mubr.msk.bf16.mxu1 %vm4344_vm0, %v4343_v3  ;;  %v1658_v56 = vshrl.u32 %v1635_v44, 16  ;;  %v1656_v61 = vpack.i.b16 %v1635_v44, %v1601_v54 }
 0x552   : > { %v2061_v42 = vpop.xlane.xlu0 %2060  ;;  %3783 = vmatprep.subr.bf16.mxu1 %v4343_v3 }
 0x553   : > { %4019 = vpow2.f32 %v2080_v45  ;;  %v2069_v47 = vsub.f32 %v4968_v46, %v2061_v42  ;;  %v1659_v63 = vpack.i.b16 %v1658_v56, %v1657_v58  ;;  %v2399_v8 = vsel %vm2121_vm3, %v1656_v61, 0 }
 0x555   : > { %v4014_v49 = vpop.eup %4013  ;;  %v2084_v50 = vmul.f32 1.442695, %v2069_v47  ;;  %v2445_v9 = vsel %vm2121_vm3, %v1659_v63, 0 }
 0x556   : > { %v2092_v51 = vsel %vm2037_vm2, %v4014_v49, 0.0  ;;  %v2112_v52 = vpack.c.bf16 %v4014_v49, %v4014_v49 }
 0x557   : > { %4021 = vpow2.f32 %v2084_v50  ;;  %2093 = vadd.xlane.f32.xlu1 %v2092_v51 }
 0x558   : > { %3756 = vmatmul.mubr.msk.bf16.vlgmr.msra.gmra.mrb[12].mxu0 %vm2037_vm2, %v2112_v52 }
 0x559   : > { %v4016_v57 = vpop.eup %4015  ;;  %3766 = vmatpush3.bf16.msra.mxu0 %v2307_v55  ;;  %3767 = vmatprep.mubr.msk.bf16.mxu0 %vm4344_vm0, %v4343_v3 }
 0x55a   : > { %v2098_v46 = vsel %vm2037_vm2, %v4016_v57, 0.0  ;;  %3777 = vmatprep.subr.bf16.mxu0 %v4343_v3  ;;  %v4018_v60 = vpop.eup %4017  ;;  %v2114_v4 = vpack.c.bf16 %v4016_v57, %v4016_v57 }
 0x55b   : > { %2099 = vadd.xlane.f32.xlu1 %v2098_v46  ;;  %v2104_v1 = vsel %vm2037_vm2, %v4018_v60, 0.0  ;;  %v2116_v15 = vpack.c.bf16 %v4018_v60, %v4018_v60 }
 0x55d   : > { %v4020_v0 = vpop.eup %4019 }
 0x55e   : > { %v2101_v2 = vsel %vm2037_vm2, %v4020_v0, 0.0  ;;  %v2115_v6 = vpack.c.bf16 %v4020_v0, %v4020_v0 }
 0x55f   : > { %2105 = vadd.xlane.f32.xlu1 %v2104_v1  ;;  %2102 = vadd.xlane.f32.xlu0 %v2101_v2 }
 0x560   : > { %3768 = vmatmul.mubr.msk.bf16.vlgmr.msra.gmra.mrb[16].mxu0 %vm2037_vm2, %v2114_v4  ;;  %3774 = vmatmul.mubr.msk.bf16.vlgmr.msra.gmra.mrb[44].mxu1 %vm2037_vm2, %v2115_v6 }
 0x561   : > { %v4022_v10 = vpop.eup %4021  ;;  %3778 = vmatpush3.bf16.msra.mxu0 %v2399_v8  ;;  %3784 = vmatpush3.bf16.msra.mxu1 %v2445_v9 }
 0x562   : > { %v2107_v62 = vsel %vm2037_vm2, %v4022_v10, 0.0  ;;  %3779 = vmatprep.mubr.msk.bf16.mxu0 %vm4344_vm0, %v4343_v3  ;;  %3785 = vmatprep.mubr.msk.bf16.mxu1 %vm4344_vm0, %v4343_v3  ;;  %v2117_v16 = vpack.c.bf16 %v4022_v10, %v4022_v10 }
 0x563   : > { %2108 = vadd.xlane.f32.xlu0 %v2107_v62  ;;  %3789 = vmatprep.subr.bf16.mxu0 %v4343_v3 }
 0x568   : > { %3780 = vmatmul.mubr.msk.bf16.vlgmr.msra.gmra.mrb[20].mxu0 %vm2037_vm2, %v2116_v15  ;;  %3786 = vmatmul.mubr.msk.bf16.vlgmr.msra.gmra.mrb[48].mxu1 %vm2037_vm2, %v2117_v16 }
 0x569   : > { %3805 = vmatprep.mubr.msk.bf16.mxu0 %vm4344_vm0, %v4343_v3  ;;  %3019 = vmatprep.mubr.bf16.mxu1 %v4354_v35 }
 0x56a   : > { %3790 = vmatpush3.bf16.msra.mxu0 %v3957_v17 }
 0x56b   : > { %3791 = vmatprep.subr.bf16.mxu0 %v4343_v3 }
 0x56e   : > { %3792 = vmatpush3.bf16.msra.mxu0 %v3958_v53 }
 0x56f   : > { %3793 = vmatprep.subr.bf16.mxu0 %v4343_v3 }
 0x572   : > { %3794 = vmatpush3.bf16.msra.mxu0 %v3959_v5 }
 0x573   : > { %3795 = vmatprep.subr.bf16.mxu0 %v4343_v3 }
 0x576   : > { %3796 = vmatpush3.bf16.msra.mxu0 %v3960_v19 }
 0x577   : > { %3797 = vmatprep.subr.bf16.mxu0 %v4343_v3 }
 0x57a   : > { %3798 = vmatpush3.bf16.msra.mxu0 %v3961_v22 }
 0x57b   : > { %3799 = vmatprep.subr.bf16.mxu0 %v4343_v3 }
 0x5a7   : > { %v2088_v29 = vpop.xlane.xlu1 %2087 }
 0x5a8   : > { %4023 = vrcp.f32 %v2088_v29 }
 0x5af   : > { %v2091_v30 = vpop.xlane.xlu0 %2090 }
 0x5b0   : > { %4025 = vrcp.f32 %v2091_v30 }
 0x5b2   : > { %v4024_v14 = vpop.eup %4023 }
 0x5ba   : > { %v4026_v45 = vpop.eup %4025 }
 0x5dc   : > { %v2097_v20 = vpop.xlane.xlu0 %2096 }
 0x5e4   : > { %v2094_v31 = vpop.xlane.xlu1 %2093 }
 0x5e8   : > { %v2100_v33 = vpop.xlane.xlu1 %2099 }
 0x5e9   : > { %4027 = vrcp.f32 %v2100_v33 }
 0x5ec   : > { %v2103_v34 = vpop.xlane.xlu0 %2102  ;;  %v2106_v39 = vpop.xlane.xlu1 %2105 }
 0x5ed   : > { %4029 = vrcp.f32 %v2103_v34 }
 0x5ee   : > { %4031 = vrcp.f32 %v2097_v20 }
 0x5ef   : > { %4033 = vrcp.f32 %v2094_v31 }
 0x5f0   : > { %v2109_v43 = vpop.xlane.xlu0 %2108  ;;  %4035 = vrcp.f32 %v2106_v39 }
 0x5f1   : > { %4037 = vrcp.f32 %v2109_v43 }
 0x5f3   : > { %v4028_v42 = vpop.eup %4027 }
 0x5f7   : > { %v4030_v47 = vpop.eup %4029 }
 0x5f8   : > { %v4032_v63 = vpop.eup %4031 }
 0x5f9   : > { %v4034_v0 = vpop.eup %4033 }
 0x5fa   : > { %v4036_v1 = vpop.eup %4035 }
 0x5fb   : > { %v4038_v2 = vpop.eup %4037 }
 0x606   : > { %v2159_v13 = vpop.f32.mrb[8].mxu0 }
 0x607   : > { %v3745_v59 = vpop.f32.mrb[9].mxu0  ;;  %v2495_v49 = vmul.f32 %v4024_v14, %v2159_v13 }
 0x608   : > { %v2162_v23 = vpop.f32.mrb[10].mxu0  ;;  %v2205_v24 = vpop.f32.mrb[36].mxu1 }
 0x609   : > { %v3746_v25 = vpop.f32.mrb[11].mxu0  ;;  %v3751_v26 = vpop.f32.mrb[37].mxu1  ;;  %v2496_v50 = vmul.f32 %v4026_v45, %v2205_v24 }
 0x60a   : > { %v2208_v27 = vpop.f32.mrb[38].mxu1 }
 0x60b   : > { %v3752_v28 = vpop.f32.mrb[39].mxu1 }
 0x623   : > { %v2297_v21 = vpop.f32.mrb[40].mxu1 }
 0x624   : > { %v3763_v32 = vpop.f32.mrb[41].mxu1  ;;  %v2498_v8 = vmul.f32 %v4032_v63, %v2297_v21 }
 0x625   : > { %v2300_v12 = vpop.f32.mrb[42].mxu1 }
 0x626   : > { %v3764_v36 = vpop.f32.mrb[43].mxu1 }
 0x62b   : > { %v2251_v37 = vpop.f32.mrb[12].mxu0 }
 0x62c   : > { %v3757_v38 = vpop.f32.mrb[13].mxu0  ;;  %v2497_v9 = vmul.f32 %v4034_v0, %v2251_v37 }
 0x62d   : > { %v2254_v41 = vpop.f32.mrb[14].mxu0 }
 0x62e   : > { %v3758_v40 = vpop.f32.mrb[15].mxu0 }
 0x633   : > { %v2343_v48 = vpop.f32.mrb[16].mxu0  ;;  %v2389_v44 = vpop.f32.mrb[44].mxu1 }
 0x634   : > { %v2499_v51 = vmul.f32 %v4028_v42, %v2343_v48  ;;  %v2500_v52 = vmul.f32 %v4030_v47, %v2389_v44  ;;  %v3769_v54 = vpop.f32.mrb[17].mxu0  ;;  %v3775_v55 = vpop.f32.mrb[45].mxu1 }
 0x635   : > { %v2346_v56 = vpop.f32.mrb[18].mxu0  ;;  %v2392_v57 = vpop.f32.mrb[46].mxu1 }
 0x636   : > { %v3491_v46 = vpack.c.bf16 %v2499_v51, %v2495_v49  ;;  %v3493_v58 = vpack.c.bf16 %v2500_v52, %v2496_v50  ;;  %v3770_v60 = vpop.f32.mrb[19].mxu0  ;;  %v3776_v61 = vpop.f32.mrb[47].mxu1  ;;  %v3962_v56 = vld [vmem:[#allocation10 + $0x28] sm:$0xff]  }
 0x637   : > { %3800 = vmatpush3.bf16.msra.mxu0 %v3962_v56  ;;  %v3971_v56 = vld [vmem:[#allocation11 + $0x20] ss:$8 sps:$4 sm:$0xff]  }
 0x638   : > { %v2518_v59 = vrot.slane %v3491_v46, %v4828_v11  ;;  %v2552_v23 = vrot.slane %v3493_v58, %v4828_v11  ;;  %3801 = vmatprep.subr.bf16.mxu0 %v4343_v3 }
 0x63b   : > { %v2435_v4 = vpop.f32.mrb[20].mxu0  ;;  %v2481_v6 = vpop.f32.mrb[48].mxu1 }
 0x63c   : > { %v2501_v10 = vmul.f32 %v4036_v1, %v2435_v4  ;;  %v2502_v62 = vmul.f32 %v4038_v2, %v2481_v6  ;;  %v3781_v15 = vpop.f32.mrb[21].mxu0  ;;  %v3787_v16 = vpop.f32.mrb[49].mxu1  ;;  %v3963_v1 = vld [vmem:[#allocation10 + $0x30] sm:$0xff]  }
 0x63d   : > { %v2438_v17 = vpop.f32.mrb[22].mxu0  ;;  %v2484_v53 = vpop.f32.mrb[50].mxu1  ;;  %3802 = vmatpush3.bf16.msra.mxu0 %v3963_v1  ;;  %v3964_v15 = vld [vmem:[#allocation10 + $0x38] sm:$0xff]   ;;  %v3977_v1 = vld [vmem:[#allocation11 + $0x40] ss:$8 sps:$4 sm:$0xff]  }
 0x63e   : > { %v3492_v5 = vpack.c.bf16 %v2501_v10, %v2497_v9  ;;  %v3494_v19 = vpack.c.bf16 %v2502_v62, %v2498_v8  ;;  %v3782_v22 = vpop.f32.mrb[23].mxu0  ;;  %v3788_v13 = vpop.f32.mrb[51].mxu1  ;;  %3803 = vmatprep.subr.bf16.mxu0 %v4343_v3 }
 0x640   : > { %v2526_v24 = vrot.slane %v3492_v5, %v4828_v11  ;;  %v2560_v25 = vrot.slane %v3494_v19, %v4828_v11 }
 0x641   : > { %3804 = vmatpush3.bf16.msra.mxu0 %v3964_v15 }
 0x642   : > { %v2527_v26 = vcombine.low %v2518_v59, %v2526_v24  ;;  %v2528_v27 = vcombine.high %v2518_v59, %v2526_v24  ;;  %v2561_v28 = vcombine.low %v2552_v23, %v2560_v25  ;;  %v2562_v29 = vcombine.high %v2552_v23, %v2560_v25 }
 0x644   : > { %v2535_v30 = vrot.slane %v2527_v26, %v4832_v18  ;;  %v2542_v31 = vrot.slane %v2528_v27, %v4832_v18  ;;  %v2569_v20 = vrot.slane %v2561_v28, %v4832_v18  ;;  %v2576_v21 = vrot.slane %v2562_v29, %v4832_v18 }
 0x646   : > { %v2543_v32 = vcombine.high %v2535_v30, %v4354_v35  ;;  %v2544_v33 = vcombine.high %v2542_v31, %v4354_v35  ;;  %v2583_v12 = vshrl.u32 %v2535_v30, 16  ;;  %v2599_v34 = vshrl.u32 %v2542_v31, 16 }
 0x647   : > { %v2577_v36 = vcombine.high %v2569_v20, %v4354_v35  ;;  %v2578_v37 = vcombine.high %v2576_v21, %v4354_v35  ;;  %v2581_v38 = vpack.i.b16 %v2569_v20, %v2535_v30  ;;  %v2584_v39 = vshrl.u32 %v2569_v20, 16 }
 0x648   : > { %v2591_v41 = vshrl.u32 %v2543_v32, 16  ;;  %v2607_v43 = vshrl.u32 %v2544_v33, 16  ;;  %v2597_v40 = vpack.i.b16 %v2576_v21, %v2542_v31  ;;  %v2600_v14 = vshrl.u32 %v2576_v21, 16 }
 0x649   : > { %v2585_v45 = vpack.i.b16 %v2584_v39, %v2583_v12  ;;  %v2589_v42 = vpack.i.b16 %v2577_v36, %v2543_v32  ;;  %v2592_v47 = vshrl.u32 %v2577_v36, 16  ;;  %v2605_v48 = vpack.i.b16 %v2578_v37, %v2544_v33 }
 0x64a   : > { %v2601_v44 = vpack.i.b16 %v2600_v14, %v2599_v34  ;;  %v2608_v49 = vshrl.u32 %v2578_v37, 16  ;;  %v2611_v50 = vcombine.low %v2581_v38, %v2597_v40 }
 0x64b   : > { %v2593_v51 = vpack.i.b16 %v2592_v47, %v2591_v41  ;;  %v2619_v52 = vcombine.low %v2589_v42, %v2605_v48  ;;  %v4053_v48 = vld [vmem:[%s4720_s12] sm:$0xff]  ;;  %s3540_s12 = sshll.u32 %s4468_s0, 7  ;;  %s4356_s0 = smov [#allocation14]  }
 0x64c   : > { %v2609_v54 = vpack.i.b16 %v2608_v49, %v2607_v43  ;;  %v2645_v55 = vcombine.low %v2585_v45, %v2601_v44  ;;  %v2618_v57 = vrot.slane %v2611_v50, %v4828_v11  ;;  %v3965_v50 = vld [vmem:[#allocation11] ss:$8 sps:$4 sm:$0xff]  }
 0x64d   : > { %v2626_v46 = vrot.slane %v2619_v52, %v4828_v11  ;;  %v3970_v52 = vld [vmem:[#allocation11 + $0x14] ss:$8 sps:$4 sm:$0xff]  }
 0x64e   : > { %v2653_v58 = vcombine.low %v2593_v51, %v2609_v54  ;;  %v2652_v63 = vrot.slane %v2645_v55, %v4828_v11  ;;  %v3967_v51 = vld [vmem:[#allocation11 + $0x4] ss:$8 sps:$4 sm:$0xff]   ;;  %v3968_v54 = vld [vmem:[#allocation11 + $0x10] ss:$8 sps:$4 sm:$0xff]  }
 0x64f   : > { %v2628_v60 = vcombine.high %v2618_v57, %v2626_v46  ;;  %v2627_v61 = vcombine.low %v2618_v57, %v2626_v46  ;;  %2987 = vmatprep.subr.bf16.mxu1 %v3967_v51  ;;  %v3973_v55 = vld [vmem:[#allocation11 + $0x24] ss:$8 sps:$4 sm:$0xff]  }
 0x650   : > { %v2660_v0 = vrot.slane %v2653_v58, %v4828_v11  ;;  %2988 = vmatpush1.bf16.msra.mxu1 %v3965_v50 }
 0x651   : > { %v2642_v2 = vrot.slane %v2628_v60, %v4832_v18  ;;  %v2635_v4 = vrot.slane %v2627_v61, %v4832_v18  ;;  %2989 = vmatprep.subr.bf16.mxu1 %v3970_v52  ;;  %v3976_v61 = vld [vmem:[#allocation11 + $0x34] ss:$8 sps:$4 sm:$0xff]  }
 0x652   : > { %v2662_v6 = vcombine.high %v2652_v63, %v2660_v0  ;;  %v2661_v8 = vcombine.low %v2652_v63, %v2660_v0  ;;  %v3974_v63 = vld [vmem:[#allocation11 + $0x30] ss:$8 sps:$4 sm:$0xff]   ;;  %v3979_v0 = vld [vmem:[#allocation11 + $0x44] ss:$8 sps:$4 sm:$0xff]  }
 0x653   : > { %v2643_v9 = vcombine.high %v2635_v4, %v4354_v35  ;;  %v2682_v16 = vshrl.u32 %v2635_v4, 16  ;;  %v2694_v17 = vshrl.u32 %v2642_v2, 16  ;;  %v2644_v11 = vcombine.high %v2642_v2, %v4354_v35 }
 0x654   : > { %v2676_v10 = vrot.slane %v2662_v6, %v4832_v18  ;;  %v2669_v62 = vrot.slane %v2661_v8, %v4832_v18  ;;  %2990 = vmatpush1.bf16.msra.mxu1 %v3968_v54  ;;  %v3985_v6 = vld [vmem:[#allocation11 + $0x64] ss:$8 sps:$4 sm:$0xff]   ;;  %v3983_v8 = vld [vmem:[#allocation11 + $0x60] ss:$8 sps:$4 sm:$0xff]  }
 0x655   : > { %v2688_v13 = vshrl.u32 %v2643_v9, 16  ;;  %v2700_v26 = vshrl.u32 %v2644_v11, 16  ;;  %2991 = vmatprep.subr.bf16.mxu1 %v3973_v55 }
 0x656   : > { %v2693_v53 = vpack.i.b16 %v2676_v10, %v2642_v2  ;;  %v2677_v5 = vcombine.high %v2669_v62, %v4354_v35  ;;  %v2683_v19 = vshrl.u32 %v2669_v62, 16  ;;  %v2695_v22 = vshrl.u32 %v2676_v10, 16  ;;  %v3982_v2 = vld [vmem:[#allocation11 + $0x54] ss:$8 sps:$4 sm:$0xff]  }
 0x657   : > { %v2678_v59 = vcombine.high %v2676_v10, %v4354_v35  ;;  %v2681_v23 = vpack.i.b16 %v2669_v62, %v2635_v4  ;;  %v3980_v4 = vld [vmem:[#allocation11 + $0x50] ss:$8 sps:$4 sm:$0xff]  }
 0x658   : > { %2709 = vrot.lane.b32.xlu1 %v2693_v53, %s4348_s17  ;;  %v2687_v3 = vpack.i.b16 %v2677_v5, %v2643_v9  ;;  %v2684_v24 = vpack.i.b16 %v2683_v19, %v2682_v16  ;;  %v2696_v18 = vpack.i.b16 %v2695_v22, %v2694_v17  ;;  %v2689_v25 = vshrl.u32 %v2677_v5, 16  ;;  %2992 = vmatpush1.bf16.msra.mxu1 %v3971_v56  ;;  %v3988_v9 = vld [vmem:[#allocation11 + $0x74] ss:$8 sps:$4 sm:$0xff]   ;;  %v3986_v10 = vld [vmem:[#allocation11 + $0x70] ss:$8 sps:$4 sm:$0xff]   ;;  %s5232_s17 = sld [smem:[#allocation26_spill]] }
 0x659   : > { %v2701_v27 = vshrl.u32 %v2678_v59, 16  ;;  %v2699_v28 = vpack.i.b16 %v2678_v59, %v2644_v11  ;;  %2993 = vmatprep.subr.bf16.mxu1 %v3976_v61  ;;  %v3989_v59 = vld [vmem:[#allocation13 + $0x40] sm:$0xff]  }
 0x65a   : > { %2705 = vrot.lane.b32.xlu0 %v2687_v3, %s4351_s1  ;;  %v2690_v29 = vpack.i.b16 %v2689_v25, %v2688_v13  ;;  %s5233_s1 = sld [smem:[#allocation27_spill]]  ;;  %3611 = vmatprep.subr.bf16.mxu0 %v3989_v59  ;;  %v3991_v3 = vld [vmem:[#allocation13 + $0x48] sm:$0xff]   ;;  %v3994_v25 = vld [vmem:[#allocation13 + $0x10] sm:$0xff]  }
 0x65b   : > { %v2702_v30 = vpack.i.b16 %v2701_v27, %v2700_v26  ;;  %v3995_v26 = vld [vmem:[#allocation13 + $0x58] sm:$0xff]  }
 0x65c   : > { %2703 = vrot.lane.b32.xlu1 %v2684_v24, %s4350_s16  ;;  %2994 = vmatpush1.bf16.msra.mxu1 %v3974_v63  ;;  %v3992_v24 = vld [vmem:[#allocation13 + $0x8] sm:$0xff]   ;;  %v3996_v27 = vld [vmem:[#allocation13 + $0x18] sm:$0xff]  }
 0x65d   : > { %2995 = vmatprep.subr.bf16.mxu1 %v3979_v0 }
 0x65e   : > { %2711 = vrot.lane.b32.xlu0 %v2696_v18, %s4345_s10  ;;  %v3504_v11 = vld [vmem:[%s5232_s17] ss:$0 sm:$0xff] }
 0x65f   : > { %v3993_v18 = vld [vmem:[#allocation13 + $0x50] sm:$0xff]  }
 0x660   : > { %2707 = vrot.lane.b32.xlu1 %v2690_v29, %s4349_s28  ;;  %2996 = vmatpush1.bf16.msra.mxu1 %v3977_v1  ;;  %v3505_v5 = vld [vmem:[%s5233_s1] ss:$0 sm:$0xff]  ;;  %v3998_v29 = vld [vmem:[#allocation13 + $0x20] sm:$0xff]   ;;  %s5236_s1 = sld [smem:[#allocation30_spill]] }
 0x661   : > { %2997 = vmatprep.subr.bf16.mxu1 %v3982_v2 }
 0x662   : > { %2715 = vrot.lane.b32.xlu0 %v2702_v30, %s4346_s7  ;;  %s5231_s7 = sld [smem:[#allocation25_spill]]  ;;  %v3999_v30 = vld [vmem:[#allocation13 + $0x68] sm:$0xff]  }
 0x664   : > { %2713 = vrot.lane.b32.xlu1 %v2699_v28, %s4347_s30  ;;  %2998 = vmatpush1.bf16.msra.mxu1 %v3980_v4  ;;  %v3997_v28 = vld [vmem:[#allocation13 + $0x60] sm:$0xff]   ;;  %s650_s30 = scalar_lea.vmem [#allocation14], %s3438_s11  ;;  %s4256_s11 = sshll.u32 %s4356_s0, 4  ;;  %s4257_s11 = int_to_ptr.vmem [resolvable:$false] %s4256_s11 }
 0x665   : > { %2999 = vmatprep.subr.bf16.mxu1 %v3985_v6  ;;  %s3299_s17 = sshll.u32 %s650_s30, 4  ;;  %s4258_s8 = scalar_lea.vmem %s4257_s11, 256  ;;  %s5128_s17 = int_to_ptr.vmem [resolvable:$true] %s3299_s17 }
 0x666   : > { %s5126_s22 = scalar_lea.hbm %s5236_s1, %s3540_s12  ;;  %p4259_p13 = scmp.lt.s32.totalorder %s5128_s17, %s4257_s11 }
 0x668   : > { %v3495_v40 = vld [vmem:[%s5231_s7] ss:$0 sm:$0xff]  ;;  %3000 = vmatpush1.bf16.msra.mxu1 %v3983_v8  ;;  %s5235_s7 = sld [smem:[#allocation29_spill]] }
 0x669   : > { %3001 = vmatprep.subr.bf16.mxu1 %v3988_v9 }
 0x66c   : > { %3002 = vmatpush1.bf16.msra.mxu1 %v3986_v10 }
 0x6ca   : > { %v2710_v35 = vpop.permute.xlu1 %2709 }
 0x6cc   : > { %v2706_v31 = vpop.permute.xlu0 %2705 }
 0x6ce   : > { %v2704_v20 = vpop.permute.xlu1 %2703 }
 0x6cf   : > { %v2719_v21 = vsel %vm1660_vm1, %v2681_v23, %v2704_v20  ;;  %v3990_v23 = vld [vmem:[#allocation13] sm:$0xff]   ;;  %v4002_v20 = vld [vmem:[#allocation13 + $0x30] sm:$0xff]  }
 0x6d0   : > { %v2712_v32 = vpop.permute.xlu0 %2711  ;;  %v2722_v12 = vsel %vm2720_vm4, %v2719_v21, %v2706_v31  ;;  %v4001_v31 = vld [vmem:[#allocation13 + $0x70] sm:$0xff]   ;;  %v4003_v21 = vld [vmem:[#allocation13 + $0x78] sm:$0xff]  }
 0x6d2   : > { %v2708_v33 = vpop.permute.xlu1 %2707 }
 0x6d3   : > { %v2725_v34 = vsel %vm2723_vm5, %v2722_v12, %v2708_v33  ;;  %v2899_v33 = vsub.s32 0, %v4825_v7  ;;  %v2895_v12 = vld [vmem:[%s5234_s20] sm:$0x3]  ;;  %s4252_s20 = scalar_lea.vmem %s5128_s17, 128 }
 0x6d4   : > { %v2728_v36 = vsel %vm2726_vm6, %v2725_v34, %v2710_v35  ;;  %v2716_v39 = vpop.permute.xlu0 %2715  ;;  %v4000_v35 = vld [vmem:[#allocation13 + $0x28] sm:$0xff]   ;;  %v2903_v34 = vsub.s32 1, %v4825_v7  ;;  %p4253_p6 = scmp.ne.s32.totalorder %s5128_s17, %s4252_s20  ;;  %p4260_p0 = scmp.lt.s32.totalorder %s4258_s8, %s4252_s20 }
 0x6d5   : > { %v2731_v37 = vsel %vm2729_vm7, %v2728_v36, %v2712_v32  ;;  %v4004_v32 = vld [vmem:[#allocation13 + $0x38] sm:$0xff]   ;;  %v2900_v36 = vrot.slane %v2895_v12, %v2899_v33 }
 0x6d6   : > { %v2714_v38 = vpop.permute.xlu1 %2713  ;;  %p4254_p12 = pnand %p4253_p6, %p5237_p9  ;;  %p4261_p2 = por %p4260_p0, %p4259_p13 }
 0x6d7   : > { %v2734_v41 = vsel %vm2732_vm8, %v2731_v37, %v2714_v38  ;;  %v2904_v37 = vrot.slane %v2895_v12, %v2903_v34  ;;  %v3522_v34 = vld [vmem:[%s5235_s7] ss:$0 sm:$0xff] }
 0x6d8   : > { %v2737_v43 = vsel %vm2735_vm9, %v2734_v41, %v2716_v39  ;;  %p4255_p1 = pneg %p4254_p12 }
 0x6d9   : > { %3806 = vmatmul.mubr.bf16.vlgmr.msra.gmra.mrb[24].mxu0 %v2737_v43 }
 0x6da   : > { %3612 = vmatpush3.bf16.msra.mxu0 %v3990_v23  ;;  %p4262_p3 = pnand %p4261_p2, %p4255_p1 }
 0x6db   : > { %3613 = vmatprep.subr.bf16.mxu0 %v3991_v3 }
 0x6de   : > { %3614 = vmatpush3.bf16.msra.mxu0 %v3992_v24  ;;  %v4355_v24 = vmov -1.0  }
 0x6df   : > { %3615 = vmatprep.subr.bf16.mxu0 %v3993_v18 }
 0x6e2   : > { %3616 = vmatpush3.bf16.msra.mxu0 %v3994_v25 }
 0x6e3   : > { %3617 = vmatprep.subr.bf16.mxu0 %v3995_v26 }
 0x6e6   : > { %3618 = vmatpush3.bf16.msra.mxu0 %v3996_v27 }
 0x6e7   : > { %3619 = vmatprep.subr.bf16.mxu0 %v3997_v28 }
 0x6ea   : > { %3620 = vmatpush3.bf16.msra.mxu0 %v3998_v29 }
 0x6eb   : > { %3621 = vmatprep.subr.bf16.mxu0 %v3999_v30 }
 0x6ee   : > { %3622 = vmatpush3.bf16.msra.mxu0 %v4000_v35 }
 0x6ef   : > { %3623 = vmatprep.subr.bf16.mxu0 %v4001_v31 }
 0x6f2   : > { %3624 = vmatpush3.bf16.msra.mxu0 %v4002_v20 }
 0x6f3   : > { %3625 = vmatprep.subr.bf16.mxu0 %v4003_v21 }
 0x6f6   : > { %3626 = vmatpush3.bf16.msra.mxu0 %v4004_v32 }
 0x7ac   : > { %v2844_v14 = vpop.f32.mrb[24].mxu0 }
 0x7ad   : > { %v2845_v45 = vadd.f32 %v3495_v40, %v2844_v14  ;;  %v3807_v42 = vpop.f32.mrb[25].mxu0 }
 0x7ae   : > { %v2847_v47 = vpop.f32.mrb[26].mxu0 }
 0x7af   : > { %v5101_v44 = vadd.f32 %v4053_v48, %v2845_v45  ;;  %v3808_v49 = vpop.f32.mrb[27].mxu0 }
 0x7b1   : > { %2853 = vadd.xlane.f32.xlu1 %v5101_v44 }
 0x83e   : > { %v2854_v57 = vpop.xlane.xlu1 %2853 }
 0x83f   : > { %v2855_v46 = vmul.f32 0.0078125, %v2854_v57 }
 0x841   : > { %v2856_v58 = vsub.f32 %v5101_v44, %v2855_v46 }
 0x843   : > { %v2857_v60 = vmul.f32 %v2856_v58, %v2856_v58 }
 0x845   : > { %2858 = vadd.xlane.f32.xlu0 %v2857_v60 }
 0x8d2   : > { %v2859_v62 = vpop.xlane.xlu0 %2858 }
 0x8d3   : > { %v2860_v15 = vmul.f32 0.0078125, %v2859_v62 }
 0x8d5   : > { %v2861_v16 = vadd.f32 1e-05, %v2860_v15 }
 0x8d7   : > { %4039 = vrsqrt.f32 %v2861_v16 }
 0x8e1   : > { %v4040_v17 = vpop.eup %4039 }
 0x8e2   : > { %v2863_v53 = vmul.f32 %v4040_v17, %v2856_v58 }
 0x8e4   : > { %v2870_v19 = vmul.f32 %v3504_v11, %v2863_v53 }
 0x8e6   : > { %v2877_v22 = vadd.f32 %v3505_v5, %v2870_v19 }
 0x8e8   : > { %v2878_v13 = vpack.c.bf16 %v2877_v22, %v2877_v22 }
 0x8ea   : > { %3020 = vmatmul.mubr.bf16.vlgmr.msra.gmra.mrb[52].mxu1 %v2878_v13 }
 0x9bd   : > { %v3021_v38 = vpop.f32.mrb[52].mxu1 }
 0x9be   : > { %v3022_v39 = vadd.f32 %v3021_v38, %v2900_v36  ;;  %v3023_v41 = vpop.f32.mrb[53].mxu1 }
 0x9bf   : > { %v3024_v43 = vadd.f32 %v3023_v41, %v2904_v37  ;;  %v3025_v40 = vpop.f32.mrb[54].mxu1 }
 0x9c0   : > { %v3030_v14 = vmul.f32 0.70710677, %v3022_v39  ;;  %v3026_v45 = vpop.f32.mrb[55].mxu1  ;;  %v3028_v29 = vmul.f32 0.5, %v3022_v39 }
 0x9c1   : > { %v3031_v42 = vmul.f32 0.70710677, %v3024_v43  ;;  %v3029_v35 = vmul.f32 0.5, %v3024_v43 }
 0x9c2   : > { %v3036_v47 = vand.u32 2147483647, %v3030_v14  ;;  %vm3032_vm10 = vcmp.ge.f32.partialorder %v3030_v14, 0.0 }
 0x9c3   : > { %v3037_v48 = vand.u32 2147483647, %v3031_v42  ;;  %vm3033_vm11 = vcmp.ge.f32.partialorder %v3031_v42, 0.0  ;;  %v3034_v18 = vsel %vm3032_vm10, 1.0, %v4355_v24 }
 0x9c4   : > { %v3038_v49 = vmul.f32 0.3275911, %v3036_v47  ;;  %v3062_v54 = vsub.f32 0.0, %v3036_v47  ;;  %v3035_v27 = vsel %vm3033_vm11, 1.0, %v4355_v24 }
 0x9c5   : > { %v3039_v50 = vmul.f32 0.3275911, %v3037_v48  ;;  %v3063_v7 = vsub.f32 0.0, %v3037_v48 }
 0x9c6   : > { %v3040_v51 = vadd.f32 1.0, %v3038_v49  ;;  %v3064_v56 = vmul.f32 %v3062_v54, %v3036_v47 }
 0x9c7   : > { %v3041_v52 = vadd.f32 1.0, %v3039_v50  ;;  %v3065_v58 = vmul.f32 %v3063_v7, %v3037_v48 }
 0x9c8   : > { %4041 = vrcp.f32 %v3040_v51  ;;  %v3066_v63 = vmul.f32 1.442695, %v3064_v56 }
 0x9c9   : > { %4043 = vrcp.f32 %v3041_v52  ;;  %v3068_v2 = vmul.f32 1.442695, %v3065_v58 }
 0x9ca   : > { %4045 = vpow2.f32 %v3066_v63 }
 0x9cb   : > { %4047 = vpow2.f32 %v3068_v2 }
 0x9d2   : > { %v4042_v55 = vpop.eup %4041 }
 0x9d3   : > { %v4044_v57 = vpop.eup %4043  ;;  %v3044_v46 = vmul.f32 1.0614054, %v4042_v55 }
 0x9d4   : > { %v3045_v60 = vmul.f32 1.0614054, %v4044_v57  ;;  %v4046_v19 = vpop.eup %4045 }
 0x9d5   : > { %v3046_v61 = vadd.f32 -1.4531521, %v3044_v46  ;;  %v4048_v13 = vpop.eup %4047 }
 0x9d6   : > { %v3047_v0 = vadd.f32 -1.4531521, %v3045_v60 }
 0x9d7   : > { %v3048_v1 = vmul.f32 %v4042_v55, %v3046_v61 }
 0x9d8   : > { %v3049_v4 = vmul.f32 %v4044_v57, %v3047_v0 }
 0x9d9   : > { %v3050_v6 = vadd.f32 1.4214138, %v3048_v1 }
 0x9da   : > { %v3051_v8 = vadd.f32 1.4214138, %v3049_v4 }
 0x9db   : > { %v3052_v9 = vmul.f32 %v4042_v55, %v3050_v6 }
 0x9dc   : > { %v3053_v10 = vmul.f32 %v4044_v57, %v3051_v8 }
 0x9dd   : > { %v3054_v62 = vadd.f32 -0.28449672, %v3052_v9 }
 0x9de   : > { %v3055_v15 = vadd.f32 -0.28449672, %v3053_v10 }
 0x9df   : > { %v3056_v16 = vmul.f32 %v4042_v55, %v3054_v62 }
 0x9e0   : > { %v3057_v17 = vmul.f32 %v4044_v57, %v3055_v15 }
 0x9e1   : > { %v3058_v11 = vadd.f32 0.2548296, %v3056_v16 }
 0x9e2   : > { %v3059_v53 = vadd.f32 0.2548296, %v3057_v17 }
 0x9e3   : > { %v3060_v5 = vmul.f32 %v4042_v55, %v3058_v11 }
 0x9e4   : > { %v3061_v22 = vmul.f32 %v4044_v57, %v3059_v53 }
 0x9e5   : > { %v3070_v59 = vmul.f32 %v4046_v19, %v3060_v5 }
 0x9e6   : > { %v3071_v23 = vmul.f32 %v4048_v13, %v3061_v22 }
 0x9e7   : > { %v3072_v3 = vsub.f32 1.0, %v3070_v59 }
 0x9e8   : > { %v3073_v25 = vsub.f32 1.0, %v3071_v23 }
 0x9e9   : > { %v3074_v26 = vmul.f32 %v3072_v3, %v3034_v18 }
 0x9ea   : > { %v3075_v28 = vmul.f32 %v3073_v25, %v3035_v27 }
 0x9eb   : > { %v3076_v30 = vadd.f32 1.0, %v3074_v26 }
 0x9ec   : > { %v3077_v31 = vadd.f32 1.0, %v3075_v28 }
 0x9ed   : > { %v3078_v20 = vmul.f32 %v3076_v30, %v3028_v29 }
 0x9ee   : > { %v3079_v21 = vmul.f32 %v3077_v31, %v3029_v35 }
 0x9ef   : > { %v3080_v33 = vpack.c.bf16 %v3078_v20, %v3078_v20 }
 0x9f0   : > { %v3081_v32 = vpack.c.bf16 %v3079_v21, %v3079_v21 }
 0x9f2   : > { %3249 = vmatprep.mubr.bf16.mxu0 %v3081_v32 }
 0x9f3   : > { %3250 = vmatmul.mubr.bf16.vlgmr.msra.gmra.mrb[28].mxu0 %v3080_v33 }
 0xac6   : > { %v3627_v12 = vpop.f32.mrb[28].mxu0 }
 0xac7   : > { %v3628_v36 = vpop.f32.mrb[29].mxu0 }
 0xac8   : > { %v3629_v37 = vadd.f32 %v3628_v36, %v3627_v12  ;;  %v3630_v38 = vpop.f32.mrb[30].mxu0 }
 0xac9   : > { %v3631_v41 = vpop.f32.mrb[31].mxu0 }
 0xaca   : > { %v3252_v40 = vadd.f32 %v3629_v37, %v3522_v34 }
 0xacc   : > { %v3258_v39 = vmul.f32 0.70710677, %v3252_v40  ;;  %v3257_v1 = vmul.f32 0.5, %v3252_v40 }
 0xace   : > { %v3261_v14 = vand.u32 2147483647, %v3258_v39  ;;  %vm3259_vm12 = vcmp.ge.f32.partialorder %v3258_v39, 0.0 }
 0xacf   : > { %v3260_v63 = vsel %vm3259_vm12, 1.0, %v4355_v24 }
 0xad0   : > { %v3262_v43 = vmul.f32 0.3275911, %v3261_v14  ;;  %v3274_v42 = vsub.f32 0.0, %v3261_v14 }
 0xad2   : > { %v3263_v45 = vadd.f32 1.0, %v3262_v43  ;;  %v3275_v48 = vmul.f32 %v3274_v42, %v3261_v14 }
 0xad4   : > { %4049 = vrcp.f32 %v3263_v45  ;;  %v3276_v51 = vmul.f32 1.442695, %v3275_v48 }
 0xad6   : > { %4051 = vpow2.f32 %v3276_v51 }
 0xade   : > { %v4050_v47 = vpop.eup %4049 }
 0xadf   : > { %v3265_v49 = vmul.f32 1.0614054, %v4050_v47 }
 0xae0   : > { %v4052_v58 = vpop.eup %4051 }
 0xae1   : > { %v3266_v50 = vadd.f32 -1.4531521, %v3265_v49 }
 0xae3   : > { %v3267_v52 = vmul.f32 %v4050_v47, %v3266_v50 }
 0xae5   : > { %v3268_v54 = vadd.f32 1.4214138, %v3267_v52 }
 0xae7   : > { %v3269_v7 = vmul.f32 %v4050_v47, %v3268_v54 }
 0xae9   : > { %v3270_v55 = vadd.f32 -0.28449672, %v3269_v7 }
 0xaeb   : > { %v3271_v56 = vmul.f32 %v4050_v47, %v3270_v55 }
 0xaed   : > { %v3272_v57 = vadd.f32 0.2548296, %v3271_v56 }
 0xaef   : > { %v3273_v46 = vmul.f32 %v4050_v47, %v3272_v57 }
 0xaf1   : > { %v3278_v60 = vmul.f32 %v4052_v58, %v3273_v46 }
 0xaf3   : > { %v3279_v61 = vsub.f32 1.0, %v3278_v60 }
 0xaf5   : > { %v3280_v0 = vmul.f32 %v3279_v61, %v3260_v63 }
 0xaf7   : > { %v3281_v2 = vadd.f32 1.0, %v3280_v0 }
 0xaf9   : > { %v3282_v4 = vmul.f32 %v3281_v2, %v3257_v1 }
 0xafb   : > { %v3283_v6 = vadd.f32 %v3282_v4, %v5101_v44 }
 0xafd   : > { %3284 = vst [vmem:[%s650_s30] sm:$0xff] %v3283_v6 }
 0xafe   : > { %4265 = shalt.err (!%p4262_p3)
}
 0xaff   : > { %s4266_s19 = scalar_lea.hbm %s5126_s22, 128  ;;  %s4270_s12 = scalar_lea.hbm %s5236_s1, 256 }
 0xb00   : > { %p4267_p4 = scmp.ne.s32.totalorder %s5126_s22, %s4266_s19  ;;  %p4271_p8 = scmp.lt.u32.totalorder %s5126_s22, %s5236_s1 }
 0xb01   : > { %p4272_p5 = scmp.lt.u32.totalorder %s4270_s12, %s4266_s19  ;;  %p4274_p6 = scmp.lt.u32.totalorder %s4266_s19, %s5126_s22 }
 0xb02   : > { %p4268_p10 = pnand %p4267_p4, %p5237_p9 }
 0xb03   : > { %p4273_p7 = por %p4272_p5, %p4271_p8 }
 0xb04   : > { %p4269_p11 = pneg %p4268_p10 }
 0xb05   : > { %p4275_p12 = por %p4274_p6, %p4273_p7 }
 0xb07   : > { %p4276_p1 = pnand %p4275_p12, %p4269_p11 }
 0xb09   : > { %4279 = shalt.err (!%p4276_p1)
}
 0xb0a   : > { %3835 = dma.vmem_to_hbm [thread:$0]  (%p5237_p9), %s5128_s17, 128, %s5126_s22, %s3286_s14  }
 0xb0b PF: > { %s3311_s16 = sand.u32 1, %s4318_s24   ;;  %p5238_p13 = scmp.ne.s32.totalorder %s5219_s29, 0 }
 0xb0c   : > { %p5239_p0 = scmp.ge.s32.totalorder %s4330_s27, 2  ;;  %s3312_s20 = scalar_lea.sflag [#allocation4], %s3311_s16 }
 0xb0e   : > { %p3861_p2 = pnand %p5239_p0, %p5238_p13 }
 0xb10   : > { %4313 = dma.done.wait (!%p3861_p2), %s3312_s20, 128  }
 0xb11   : > { %4315 = vsyncadd (!%p3861_p2), %s3312_s20, 4294967168  ;;  %p33_p3 = scmp.ge.s32.totalorder %s4638_s18, 4   ;;  %s5240_s24 = smov %s4322_s25 }
 0xb12   : > { %s5241_s25 = smov %s4326_s26  ;;  %s5242_s26 = smov %s4649_s21 }
 0xb13   : > { %s5243_s27 = smov %s4638_s18  ;;  %35 = sbr.rel (!%p33_p3) target bundleno = 20 (0x14), region = 157 }
 0xb1a   :  { %3317 = vsyncpa [#allocation3], 1 }
 0xb1b   :  { %3319 = vsyncpa [#allocation3 + $0x1], 1 }
 0xb1c   :  { %3320 = vsyncpa [#allocation6], 1 }
 0xb1d   :  { %3321 = vsyncpa [#allocation9], 1 }
 0xb1e   :  { %3322 = vsyncpa [#allocation12], 1 }
 0xb1f   :  { %3323 = vsyncpa [#allocation4], 1 }
 0xb20   :  { %3325 = vsyncpa [#allocation4 + $0x1], 1 }

</bundles_post_ra>
